<compile_context>
chip_gen: v5e
topology: v5e:2x2
jax: 0.10.0
libtpu: 0.0.40
codegen_flags: <defaults>
</compile_context>

<pallas_src>
import functools

import jax
import jax.numpy as jnp
from jax import lax
from jax.experimental import pallas as pl
from jax.experimental.pallas import tpu as pltpu

KSIZE = 7
PAD = KSIZE // 2

# Dense banded-matrix spatial conv only while the two (HW, HW) matrices stay
# small; beyond this the 49-tap roll path is used instead.
_DENSE_SPATIAL_MAX_HW = 512


def _cdiv(a, b):
    return -(-a // b)


def _round_up(a, m):
    return _cdiv(a, m) * m


def _sigmoid(v):
    # Stable sigmoid: exp of a non-positive argument only (EUP slot), no inf
    # intermediates for very negative / positive inputs.
    e = jnp.exp(-jnp.abs(v))
    return jnp.where(v >= 0, 1.0 / (1.0 + e), e / (1.0 + e))


def _channel_attention(x, w1, b1, w2, b2):
    """x: (TN, C, HW) f32 -> channel-rescaled x (TN, C, HW) f32."""
    tn = x.shape[0]
    avg = jnp.mean(x, axis=2)                           # (TN, C)
    mx = jnp.max(x, axis=2)                             # (TN, C)
    # One MLP pass over the stacked pools; TN is (almost always) a multiple of 8
    # so the row split below stays on a sublane-tile boundary.
    pooled = jnp.concatenate([avg, mx], axis=0)         # (2*TN, C)
    h = jnp.dot(pooled, w1, preferred_element_type=jnp.float32) + b1
    h = jnp.maximum(h, 0.0)
    z = jnp.dot(h, w2, preferred_element_type=jnp.float32) + b2
    scale = _sigmoid(z[:tn] + z[tn:])                   # (TN, C)
    return x * scale[:, :, None]


def cbam_dense_kernel(x_ref, w1_ref, b1_ref, w2_ref, b2_ref,
                      ma_ref, mm_ref, cb_ref, o_ref):
    """Small-HW path: 7x7 'same' conv folded into two MXU matmuls."""
    x = x_ref[...].astype(jnp.float32)
    xc = _channel_attention(x, w1_ref[...], b1_ref[...], w2_ref[...], b2_ref[...])

    amap = jnp.mean(xc, axis=1)                         # (TN, HW)
    mmap = jnp.max(xc, axis=1)                          # (TN, HW)
    sp = (jnp.dot(amap, ma_ref[...], preferred_element_type=jnp.float32)
          + jnp.dot(mmap, mm_ref[...], preferred_element_type=jnp.float32)
          + cb_ref[0])
    o_ref[...] = (xc * _sigmoid(sp)[:, None, :]).astype(o_ref.dtype)


def cbam_roll_kernel(shifts, x_ref, w1_ref, b1_ref, w2_ref, b2_ref,
                     wa_ref, wm_ref, cb_ref, o_ref):
    """Large-HW path: 49-tap shifted accumulation.

    shifted_map[p] = map[(p + dy*W + dx) mod HW] is a circular lane roll; the
    precomputed per-tap weights wa/wm are already zeroed where the true 'same'
    conv would read outside the image, so the circular wrap never contributes.
    """
    x = x_ref[...].astype(jnp.float32)
    xc = _channel_attention(x, w1_ref[...], b1_ref[...], w2_ref[...], b2_ref[...])

    amap = jnp.mean(xc, axis=1)                         # (TN, HW)
    mmap = jnp.max(xc, axis=1)                          # (TN, HW)
    sp = jnp.zeros_like(amap) + cb_ref[0]
    for k, r in enumerate(shifts):                      # 49 static taps, unrolled
        wa = wa_ref[k:k + 1, :]                         # (1, HW) masked tap weight
        wm = wm_ref[k:k + 1, :]
        if r == 0:
            sa, sm = amap, mmap
        else:
            sa = pltpu.roll(amap, shift=r, axis=1)      # XLU lane rotation
            sm = pltpu.roll(mmap, shift=r, axis=1)
        sp = sp + sa * wa + sm * wm
    o_ref[...] = (xc * _sigmoid(sp)[:, None, :]).astype(o_ref.dtype)


def _spatial_conv_matrices(conv_w, H, W):
    """Ma, Mm (HW, HW) with  amap @ Ma + mmap @ Mm == conv2d_same([avg|max], w).

    M[(y_src, x_src), (y_out, x_out)] = w[c, y_src - y_out + PAD, x_src - x_out + PAD]
    when both offsets are within the 7x7 window; data-independent, built once.
    """
    yy, xx = jnp.meshgrid(jnp.arange(H), jnp.arange(W), indexing="ij")
    sy = yy.reshape(-1)
    sx = xx.reshape(-1)
    dy = sy[:, None] - sy[None, :]                      # source minus output
    dx = sx[:, None] - sx[None, :]
    valid = (jnp.abs(dy) <= PAD) & (jnp.abs(dx) <= PAD)
    ky = jnp.clip(dy + PAD, 0, KSIZE - 1)
    kx = jnp.clip(dx + PAD, 0, KSIZE - 1)
    ma = jnp.where(valid, conv_w[0][ky, kx], 0.0).astype(jnp.float32)
    mm = jnp.where(valid, conv_w[1][ky, kx], 0.0).astype(jnp.float32)
    return ma, mm


def _spatial_conv_taps(conv_w, H, W):
    """Masked per-tap weights (49, HW) + static roll shifts for the roll path."""
    HW = H * W
    yy, xx = jnp.meshgrid(jnp.arange(H), jnp.arange(W), indexing="ij")
    oy = yy.reshape(-1)                                 # output pixel coords per lane
    ox = xx.reshape(-1)
    wa_rows, wm_rows, shifts = [], [], []
    for dy in range(-PAD, PAD + 1):
        for dx in range(-PAD, PAD + 1):
            valid = ((oy + dy >= 0) & (oy + dy < H) &
                     (ox + dx >= 0) & (ox + dx < W)).astype(jnp.float32)
            wa_rows.append(valid * conv_w[0, dy + PAD, dx + PAD])
            wm_rows.append(valid * conv_w[1, dy + PAD, dx + PAD])
            # shifted[p] = map[p + dy*W + dx]  ==  jnp.roll(map, -(dy*W + dx))
            shifts.append((-(dy * W + dx)) % HW)
    return jnp.stack(wa_rows), jnp.stack(wm_rows), tuple(shifts)


def _vmem_limit_bytes():
    """Per-generation VMEM limit: ~3/4 of physical, capped at 96 MiB.

    v7x (64 MiB per TC) -> 48 MiB; v5e/v6e (128 MiB) -> 96 MiB.
    """
    cap = 64 * 1024 * 1024                              # conservative fallback
    try:
        cap = int(pltpu.get_tpu_info().vmem_capacity_bytes)
    except Exception:
        pass
    return min(cap * 3 // 4, 96 * 1024 * 1024)


def _choose_tn(n, per_frame_bytes, budget_bytes):
    """Largest multiple-of-8 frame count whose working set fits the VMEM budget,
    while keeping >= 4 grid steps (>= 2 per TensorCore on dual-TC chips) when N
    is large enough to allow it."""
    tn_mem = max(1, budget_bytes // max(per_frame_bytes, 1))
    tn_steps = max(8, _round_up(_cdiv(n, 4), 8))
    tn = min(tn_mem, tn_steps, _round_up(n, 8))
    if tn >= 8:
        tn -= tn % 8
    return max(tn, 1)


@functools.partial(jax.jit, static_argnames=("spatial_mode",))
def cbam_pallas(x, params, spatial_mode="auto"):
    """x: (B, T, C, H, W).  Returns the same shape/dtype (CBAM applied per frame)."""
    w1, b1, w2, b2, conv_w, conv_b = params
    Bd, Td, C, H, W = x.shape
    N = Bd * Td
    HW = H * W
    Cr = w1.shape[1]
    hid = max(128, _round_up(Cr, 128))                  # pad MLP hidden to full lanes

    # Free reshape, native NCHW + native dtype: no wrapper-side astype pass.
    x3 = x.reshape(N, C, HW)

    # Zero-padding of the hidden dim is exact: extra units have 0 weight & bias
    # -> relu(0)=0 -> zero contribution through the (zeroed) w2 rows.
    w1p = jnp.zeros((C, hid), jnp.float32).at[:, :Cr].set(w1.astype(jnp.float32))
    b1p = jnp.zeros((1, hid), jnp.float32).at[:, :Cr].set(
        jnp.reshape(b1, (1, Cr)).astype(jnp.float32))
    w2p = jnp.zeros((hid, C), jnp.float32).at[:Cr, :].set(w2.astype(jnp.float32))
    b2p = jnp.reshape(b2, (1, C)).astype(jnp.float32)
    cb = jnp.reshape(conv_b, (1,)).astype(jnp.float32)

    use_dense = (spatial_mode == "dense") or (
        spatial_mode == "auto" and HW <= _DENSE_SPATIAL_MAX_HW)
    if use_dense:
        ma, mm = _spatial_conv_matrices(conv_w.astype(jnp.float32), H, W)
        sp_a, sp_b = ma, mm
        kernel = cbam_dense_kernel
        conv_const_bytes = 2 * HW * HW * 4
    else:
        wa, wm, shifts = _spatial_conv_taps(conv_w.astype(jnp.float32), H, W)
        sp_a, sp_b = wa, wm
        kernel = functools.partial(cbam_roll_kernel, shifts)
        conv_const_bytes = 2 * KSIZE * KSIZE * HW * 4

    # Per-generation block sizing.
    vmem_limit = _vmem_limit_bytes()
    const_bytes = conv_const_bytes + (2 * C * hid + hid + C) * 4
    in_b = jnp.dtype(x.dtype).itemsize
    out_b = in_b
    # Double-buffered in + out blocks, plus ~3 f32 temporaries per element
    # (x_f32, xc, scaled result) inside the body.
    per_frame = C * HW * (2 * in_b + 2 * out_b + 12)
    budget = int(vmem_limit * 0.6) - 2 * const_bytes    # 2x: worst-case buffering
    TN = _choose_tn(N, per_frame, budget)
    grid = (_cdiv(N, TN),)                              # ragged edge block is fine

    vmem_const = pl.BlockSpec(memory_space=pltpu.MemorySpace.VMEM)
    out3 = pl.pallas_call(
        kernel,
        out_shape=jax.ShapeDtypeStruct((N, C, HW), x.dtype),
        grid=grid,
        in_specs=[
            pl.BlockSpec((TN, C, HW), lambda n: (n, 0, 0)),
            vmem_const,   # w1
            vmem_const,   # b1
            vmem_const,   # w2
            vmem_const,   # b2
            vmem_const,   # M_avg  | tap weights (avg)
            vmem_const,   # M_max  | tap weights (max)
            pl.BlockSpec(memory_space=pltpu.MemorySpace.SMEM),   # conv bias
        ],
        out_specs=pl.BlockSpec((TN, C, HW), lambda n: (n, 0, 0)),
        compiler_params=pltpu.CompilerParams(
            dimension_semantics=("parallel",),
            vmem_limit_bytes=vmem_limit,
        ),
    )(x3, w1p, b1p, w2p, b2p, sp_a, sp_b, cb)

    # Free reshape back; no transpose.
    return out3.reshape(Bd, Td, C, H, W)


def cbam_reference(x, params):
    """Pure-JAX reference mirroring the PyTorch module semantics (f32)."""
    w1, b1, w2, b2, conv_w, conv_b = params
    Bd, Td, C, H, W = x.shape
    xf = x.reshape(Bd * Td, C, H, W).astype(jnp.float32)
    avg = xf.mean(axis=(2, 3))
    mx = xf.max(axis=(2, 3))

    def mlp(v):
        return jnp.maximum(v @ w1 + b1, 0.0) @ w2 + b2

    cs = jax.nn.sigmoid(mlp(avg) + mlp(mx))
    xc = xf * cs[:, :, None, None]
    amap = xc.mean(axis=1, keepdims=True)
    mmap = xc.max(axis=1, keepdims=True)
    cat = jnp.concatenate([amap, mmap], axis=1)          # (N, 2, H, W)
    conv = lax.conv_general_dilated(
        cat, conv_w.reshape(1, 2, KSIZE, KSIZE), window_strides=(1, 1),
        padding="SAME", dimension_numbers=("NCHW", "OIHW", "NCHW")) + conv_b
    ss = jax.nn.sigmoid(conv)
    return (xc * ss).reshape(Bd, Td, C, H, W)


def _make_params(keys, C, reduction_ratio):
    Cr = max(C // reduction_ratio, 1)
    w1 = jax.random.normal(keys[0], (C, Cr), jnp.float32) * 0.2
    b1 = jax.random.normal(keys[1], (1, Cr), jnp.float32) * 0.1
    w2 = jax.random.normal(keys[2], (Cr, C), jnp.float32) * 0.2
    b2 = jax.random.normal(keys[3], (1, C), jnp.float32) * 0.1
    cw = jax.random.normal(keys[4], (2, KSIZE, KSIZE), jnp.float32) * 0.1
    cbv = jax.random.normal(keys[5], (), jnp.float32) * 0.1
    return (w1, b1, w2, b2, cw, cbv)


if __name__ == "__main__":
    # --- Test 1: dense-M spatial path, lane-dense HW=256, N=16 -> TN=8, 2 steps.
    Bd, Td, C, H, W = 2, 8, 16, 16, 16
    ks = jax.random.split(jax.random.PRNGKey(0), 7)
    x = jax.random.normal(ks[0], (Bd, Td, C, H, W), jnp.float32)
    params = _make_params(ks[1:], C, reduction_ratio=8)

    out = jax.block_until_ready(cbam_pallas(x, params))
    ref = jax.block_until_ready(cbam_reference(x, params))
    assert out.shape == x.shape and out.dtype == x.dtype
    err = float(jnp.max(jnp.abs(out.astype(jnp.float32) - ref)))
    assert err < 1e-3, f"dense path max |err| = {err}"

    # --- Test 2: roll-based spatial path + ragged N (N=11, TN=8 -> masked edge block).
    Bd2, Td2, C2, H2, W2 = 1, 11, 8, 16, 16
    ks2 = jax.random.split(jax.random.PRNGKey(1), 7)
    x2 = jax.random.normal(ks2[0], (Bd2, Td2, C2, H2, W2), jnp.float32)
    params2 = _make_params(ks2[1:], C2, reduction_ratio=4)

    out2 = jax.block_until_ready(cbam_pallas(x2, params2, spatial_mode="roll"))
    ref2 = jax.block_until_ready(cbam_reference(x2, params2))
    assert out2.shape == x2.shape and out2.dtype == x2.dtype
    err2 = float(jnp.max(jnp.abs(out2.astype(jnp.float32) - ref2)))
    assert err2 < 1e-3, f"roll path max |err| = {err2}"

    print("KERNEL_OK")
</pallas_src>

<mosaic_0001>
module attributes {stable_mosaic.version = 11 : i64} {
  func.func @cbam_dense_kernel(%arg0: i32, %arg1: memref<8x16x256xf32, #tpu.memory_space<vmem>>, %arg2: memref<16x128xf32, #tpu.memory_space<vmem>>, %arg3: memref<1x128xf32, #tpu.memory_space<vmem>>, %arg4: memref<128x16xf32, #tpu.memory_space<vmem>>, %arg5: memref<1x16xf32, #tpu.memory_space<vmem>>, %arg6: memref<256x256xf32, #tpu.memory_space<vmem>>, %arg7: memref<256x256xf32, #tpu.memory_space<vmem>>, %arg8: memref<1xf32, #tpu.memory_space<smem>>, %arg9: memref<8x16x256xf32, #tpu.memory_space<vmem>>) attributes {dimension_semantics = [#tpu.dimension_semantics<parallel>], iteration_bounds = array<i64: 2>, scalar_prefetch = 0 : i64, scratch_operands = 0 : i64, tpu.core_type = #tpu.core_type<tc>, window_params = [{transform_indices = @transform_0, window_bounds = array<i64: 8, 16, 256>}, {pipeline_mode = #tpu.pipeline_mode<synchronous>, transform_indices = @transform_1, window_bounds = array<i64: 16, 128>}, {pipeline_mode = #tpu.pipeline_mode<synchronous>, transform_indices = @transform_2, window_bounds = array<i64: 1, 128>}, {pipeline_mode = #tpu.pipeline_mode<synchronous>, transform_indices = @transform_3, window_bounds = array<i64: 128, 16>}, {pipeline_mode = #tpu.pipeline_mode<synchronous>, transform_indices = @transform_4, window_bounds = array<i64: 1, 16>}, {pipeline_mode = #tpu.pipeline_mode<synchronous>, transform_indices = @transform_5, window_bounds = array<i64: 256, 256>}, {pipeline_mode = #tpu.pipeline_mode<synchronous>, transform_indices = @transform_6, window_bounds = array<i64: 256, 256>}, {transform_indices = @transform_7, window_bounds = array<i64: 1>}, {transform_indices = @transform_8, window_bounds = array<i64: 8, 16, 256>}]} {
    %c0 = arith.constant 0 : index
    %c0_0 = arith.constant 0 : index
    %c0_1 = arith.constant 0 : index
    %0 = vector.load %arg1[%c0, %c0_0, %c0_1] : memref<8x16x256xf32, #tpu.memory_space<vmem>>, vector<8x16x256xf32>
    %c0_2 = arith.constant 0 : index
    %c0_3 = arith.constant 0 : index
    %1 = vector.load %arg2[%c0_2, %c0_3] : memref<16x128xf32, #tpu.memory_space<vmem>>, vector<16x128xf32>
    %c0_4 = arith.constant 0 : index
    %c0_5 = arith.constant 0 : index
    %2 = vector.load %arg3[%c0_4, %c0_5] : memref<1x128xf32, #tpu.memory_space<vmem>>, vector<1x128xf32>
    %c0_6 = arith.constant 0 : index
    %c0_7 = arith.constant 0 : index
    %3 = vector.load %arg4[%c0_6, %c0_7] : memref<128x16xf32, #tpu.memory_space<vmem>>, vector<128x16xf32>
    %c0_8 = arith.constant 0 : index
    %c0_9 = arith.constant 0 : index
    %4 = vector.load %arg5[%c0_8, %c0_9] : memref<1x16xf32, #tpu.memory_space<vmem>>, vector<1x16xf32>
    %cst = arith.constant dense<0.000000e+00> : vector<8x16xf32>
    %5 = vector.multi_reduction <add>, %0, %cst [2] : vector<8x16x256xf32> to vector<8x16xf32>
    %cst_10 = arith.constant 2.560000e+02 : f32
    %6 = vector.broadcast %cst_10 : f32 to vector<8x16xf32>
    %7 = arith.divf %5, %6 : vector<8x16xf32>
    %cst_11 = arith.constant dense<0xFF800000> : vector<8x16xf32>
    %8 = vector.multi_reduction <maximumf>, %0, %cst_11 [2] : vector<8x16x256xf32> to vector<8x16xf32>
    %9 = tpu.concatenate %7, %8 in 0 : vector<8x16xf32>, vector<8x16xf32> -> vector<16x16xf32>
    %cst_12 = arith.constant dense<0.000000e+00> : vector<16x128xf32>
    %10 = tpu.matmul %9, %1, %cst_12 {dimension_numbers = #tpu.dot_dimension_numbers<[1], [0], [0], [1], [0, 0, 1, 1], [], []>} : vector<16x16xf32>, vector<16x128xf32>, vector<16x128xf32> -> vector<16x128xf32>
    %11 = vector.broadcast %2 : vector<1x128xf32> to vector<16x128xf32>
    %12 = arith.addf %10, %11 : vector<16x128xf32>
    %cst_13 = arith.constant 0.000000e+00 : f32
    %13 = vector.broadcast %cst_13 : f32 to vector<16x128xf32>
    %14 = arith.maximumf %12, %13 : vector<16x128xf32>
    %cst_14 = arith.constant dense<0.000000e+00> : vector<16x16xf32>
    %15 = tpu.matmul %14, %3, %cst_14 {dimension_numbers = #tpu.dot_dimension_numbers<[1], [0], [0], [1], [0, 0, 1, 1], [], []>} : vector<16x128xf32>, vector<128x16xf32>, vector<16x16xf32> -> vector<16x16xf32>
    %16 = vector.broadcast %4 : vector<1x16xf32> to vector<16x16xf32>
    %17 = arith.addf %15, %16 : vector<16x16xf32>
    %18 = vector.extract_strided_slice %17 {offsets = [0, 0], sizes = [8, 16], strides = [1, 1]} : vector<16x16xf32> to vector<8x16xf32>
    %19 = vector.extract_strided_slice %17 {offsets = [8, 0], sizes = [8, 16], strides = [1, 1]} : vector<16x16xf32> to vector<8x16xf32>
    %20 = arith.addf %18, %19 : vector<8x16xf32>
    %21 = math.absf %20 : vector<8x16xf32>
    %cst_15 = arith.constant 0.000000e+00 : f32
    %22 = vector.broadcast %cst_15 : f32 to vector<8x16xf32>
    %23 = arith.subf %22, %21 : vector<8x16xf32>
    %24 = math.exp %23 : vector<8x16xf32>
    %cst_16 = arith.constant 0.000000e+00 : f32
    %25 = vector.broadcast %cst_16 : f32 to vector<8x16xf32>
    %26 = arith.cmpf oge, %20, %25 : vector<8x16xf32>
    %cst_17 = arith.constant 1.000000e+00 : f32
    %27 = vector.broadcast %cst_17 : f32 to vector<8x16xf32>
    %28 = arith.addf %27, %24 : vector<8x16xf32>
    %cst_18 = arith.constant 1.000000e+00 : f32
    %29 = vector.broadcast %cst_18 : f32 to vector<8x16xf32>
    %30 = arith.divf %29, %28 : vector<8x16xf32>
    %cst_19 = arith.constant 1.000000e+00 : f32
    %31 = vector.broadcast %cst_19 : f32 to vector<8x16xf32>
    %32 = arith.addf %31, %24 : vector<8x16xf32>
    %33 = arith.divf %24, %32 : vector<8x16xf32>
    %34 = arith.select %26, %30, %33 : vector<8x16xi1>, vector<8x16xf32>
    %35 = vector.shape_cast %34 : vector<8x16xf32> to vector<8x16x1xf32>
    %36 = vector.broadcast %35 : vector<8x16x1xf32> to vector<8x16x256xf32>
    %37 = arith.mulf %0, %36 : vector<8x16x256xf32>
    %cst_20 = arith.constant dense<0.000000e+00> : vector<8x256xf32>
    %38 = vector.multi_reduction <add>, %37, %cst_20 [1] : vector<8x16x256xf32> to vector<8x256xf32>
    %cst_21 = arith.constant 1.600000e+01 : f32
    %39 = vector.broadcast %cst_21 : f32 to vector<8x256xf32>
    %40 = arith.divf %38, %39 : vector<8x256xf32>
    %cst_22 = arith.constant dense<0xFF800000> : vector<8x256xf32>
    %41 = vector.multi_reduction <maximumf>, %37, %cst_22 [1] : vector<8x16x256xf32> to vector<8x256xf32>
    %c0_23 = arith.constant 0 : index
    %c0_24 = arith.constant 0 : index
    %42 = vector.load %arg6[%c0_23, %c0_24] : memref<256x256xf32, #tpu.memory_space<vmem>>, vector<256x256xf32>
    %cst_25 = arith.constant dense<0.000000e+00> : vector<8x256xf32>
    %43 = tpu.matmul %40, %42, %cst_25 {dimension_numbers = #tpu.dot_dimension_numbers<[1], [0], [0], [1], [0, 0, 1, 1], [], []>} : vector<8x256xf32>, vector<256x256xf32>, vector<8x256xf32> -> vector<8x256xf32>
    %c0_26 = arith.constant 0 : index
    %c0_27 = arith.constant 0 : index
    %44 = vector.load %arg7[%c0_26, %c0_27] : memref<256x256xf32, #tpu.memory_space<vmem>>, vector<256x256xf32>
    %cst_28 = arith.constant dense<0.000000e+00> : vector<8x256xf32>
    %45 = tpu.matmul %41, %44, %cst_28 {dimension_numbers = #tpu.dot_dimension_numbers<[1], [0], [0], [1], [0, 0, 1, 1], [], []>} : vector<8x256xf32>, vector<256x256xf32>, vector<8x256xf32> -> vector<8x256xf32>
    %46 = arith.addf %43, %45 : vector<8x256xf32>
    %c0_29 = arith.constant 0 : index
    %47 = memref.load %arg8[%c0_29] : memref<1xf32, #tpu.memory_space<smem>>
    %48 = vector.broadcast %47 : f32 to vector<8x256xf32>
    %49 = arith.addf %46, %48 : vector<8x256xf32>
    %50 = math.absf %49 : vector<8x256xf32>
    %cst_30 = arith.constant 0.000000e+00 : f32
    %51 = vector.broadcast %cst_30 : f32 to vector<8x256xf32>
    %52 = arith.subf %51, %50 : vector<8x256xf32>
    %53 = math.exp %52 : vector<8x256xf32>
    %cst_31 = arith.constant 0.000000e+00 : f32
    %54 = vector.broadcast %cst_31 : f32 to vector<8x256xf32>
    %55 = arith.cmpf oge, %49, %54 : vector<8x256xf32>
    %cst_32 = arith.constant 1.000000e+00 : f32
    %56 = vector.broadcast %cst_32 : f32 to vector<8x256xf32>
    %57 = arith.addf %56, %53 : vector<8x256xf32>
    %cst_33 = arith.constant 1.000000e+00 : f32
    %58 = vector.broadcast %cst_33 : f32 to vector<8x256xf32>
    %59 = arith.divf %58, %57 : vector<8x256xf32>
    %cst_34 = arith.constant 1.000000e+00 : f32
    %60 = vector.broadcast %cst_34 : f32 to vector<8x256xf32>
    %61 = arith.addf %60, %53 : vector<8x256xf32>
    %62 = arith.divf %53, %61 : vector<8x256xf32>
    %63 = arith.select %55, %59, %62 : vector<8x256xi1>, vector<8x256xf32>
    %64 = vector.shape_cast %63 : vector<8x256xf32> to vector<8x1x256xf32>
    %65 = vector.broadcast %64 : vector<8x1x256xf32> to vector<8x16x256xf32>
    %66 = arith.mulf %37, %65 : vector<8x16x256xf32>
    %c0_35 = arith.constant 0 : index
    %c0_36 = arith.constant 0 : index
    %c0_37 = arith.constant 0 : index
    %67 = vector.load %arg9[%c0_35, %c0_36, %c0_37] : memref<8x16x256xf32, #tpu.memory_space<vmem>>, vector<8x16x256xf32>
    tpu.vector_store %arg9[%c0_35, %c0_36, %c0_37], %66 {strides = array<i32>} : memref<8x16x256xf32, #tpu.memory_space<vmem>>, vector<8x16x256xf32>,
    return
  }
  func.func @transform_0(%arg0: i32) -> (i32, i32, i32) {
    %c0_i32 = arith.constant 0 : i32
    %c0_i32_0 = arith.constant 0 : i32
    %c0_i32_1 = arith.constant 0 : i32
    return %arg0, %c0_i32, %c0_i32_0 : i32, i32, i32
  }
  func.func @transform_1(%arg0: i32) -> (i32, i32) {
    %c0_i32 = arith.constant 0 : i32
    %c0_i32_0 = arith.constant 0 : i32
    %c0_i32_1 = arith.constant 0 : i32
    return %c0_i32, %c0_i32_0 : i32, i32
  }
  func.func @transform_2(%arg0: i32) -> (i32, i32) {
    %c0_i32 = arith.constant 0 : i32
    %c0_i32_0 = arith.constant 0 : i32
    %c0_i32_1 = arith.constant 0 : i32
    return %c0_i32, %c0_i32_0 : i32, i32
  }
  func.func @transform_3(%arg0: i32) -> (i32, i32) {
    %c0_i32 = arith.constant 0 : i32
    %c0_i32_0 = arith.constant 0 : i32
    %c0_i32_1 = arith.constant 0 : i32
    return %c0_i32, %c0_i32_0 : i32, i32
  }
  func.func @transform_4(%arg0: i32) -> (i32, i32) {
    %c0_i32 = arith.constant 0 : i32
    %c0_i32_0 = arith.constant 0 : i32
    %c0_i32_1 = arith.constant 0 : i32
    return %c0_i32, %c0_i32_0 : i32, i32
  }
  func.func @transform_5(%arg0: i32) -> (i32, i32) {
    %c0_i32 = arith.constant 0 : i32
    %c0_i32_0 = arith.constant 0 : i32
    %c0_i32_1 = arith.constant 0 : i32
    return %c0_i32, %c0_i32_0 : i32, i32
  }
  func.func @transform_6(%arg0: i32) -> (i32, i32) {
    %c0_i32 = arith.constant 0 : i32
    %c0_i32_0 = arith.constant 0 : i32
    %c0_i32_1 = arith.constant 0 : i32
    return %c0_i32, %c0_i32_0 : i32, i32
  }
  func.func @transform_7(%arg0: i32) -> i32 {
    %c0_i32 = arith.constant 0 : i32
    %c0_i32_0 = arith.constant 0 : i32
    return %c0_i32 : i32
  }
  func.func @transform_8(%arg0: i32) -> (i32, i32, i32) {
    %c0_i32 = arith.constant 0 : i32
    %c0_i32_0 = arith.constant 0 : i32
    %c0_i32_1 = arith.constant 0 : i32
    return %arg0, %c0_i32, %c0_i32_0 : i32, i32, i32
  }
}

</mosaic_0001>

<bundles_post_ra>
// kernel: sub.22
= control target key start
LH: loop header
LB: loop body
LE: loop exit
PB: predicated region body
PF: predicated region fallthrough
CT: control target
= control target key end

     0   :  { %s7_s6 = smov 3  ;;  %s21_s9 = smov 3  ;;  %vm4_vm0 = vcmask 130048   ;;  %vm11_vm1 = vcmask 1048448   ;;  %vm18_vm2 = vcmask 917248   ;;  %vm25_vm3 = vcmask 786048   ;;  %s119_s0 = inlined_call_operand.vmem [shape: s32[16,16], index: 0, kind: input, shape index: {}]   ;;  %s120_s1 = inlined_call_operand.vmem [shape: s32[256], index: 1, kind: output, shape index: {}]  }
   0x1   :  { %v61_v0 = vld [vmem:[%s119_s0 + $0x7] ss:$8 sm:%s7_s6]   ;;  %s75_s10 = smov 112   ;;  %v63_v1 = vld [vmem:[%s119_s0 + $0x5] ss:$8 sm:%s21_s9]   ;;  %s76_s13 = smov 80  }
   0x2   :  { %9 = vrot.lane.b32.xlu0 %v61_v0, %s75_s10  ;;  %23 = vrot.lane.b32.xlu1 %v63_v1, %s76_s13  ;;  %s14_s14 = smov 3  ;;  %s28_s15 = smov 3  ;;  %vm32_vm4 = vcmask 654848   ;;  %vm39_vm5 = vcmask 523648   ;;  %vm46_vm6 = vcmask 392448   ;;  %vm53_vm7 = vcmask 261248  }
   0x3   :  { %s35_s16 = smov 3  ;;  %v62_v3 = vld [vmem:[%s119_s0 + $0x6] ss:$8 sm:%s14_s14]   ;;  %s77_s21 = smov 48   ;;  %v64_v4 = vld [vmem:[%s119_s0 + $0x4] ss:$8 sm:%s28_s15]  }
   0x4   :  { %v65_v2 = vld [vmem:[%s119_s0 + $0x3] ss:$8 sm:%s35_s16]   ;;  %s42_s24 = smov 3  ;;  %s78_s25 = smov 96  }
   0x5   :  { %37 = vrot.lane.b32.xlu2 %v65_v2, %s77_s21  ;;  %s79_s26 = smov 64   ;;  %s49_s27 = smov 3  ;;  %v66_v5 = vld [vmem:[%s119_s0 + $0x2] ss:$8 sm:%s42_s24]  }
   0x6   :  { %v67_v6 = vld [vmem:[%s119_s0 + $0x1] ss:$8 sm:%s49_s27]   ;;  %s80_s3 = smov 32   ;;  %s81_s4 = smov 16  }
   0x7   :  { %s2_s5 = smov 3 }
   0x8   :  { %v3_v7 = vld [vmem:[%s119_s0] ss:$8 sm:%s2_s5]  }
   0x9   :  { %5 = vst.msk [vmem:[#allocation0] sm:$0x3] %vm4_vm0, %v3_v7  }
   0xa   :  { %16 = vrot.lane.b32.xlu0 %v62_v3, %s78_s25  ;;  %30 = vrot.lane.b32.xlu1 %v64_v4, %s79_s26 }
   0xd   :  { %44 = vrot.lane.b32.xlu2 %v66_v5, %s80_s3 }
  0x12   :  { %51 = vrot.lane.b32.xlu0 %v67_v6, %s81_s4 }
  0x5f   :  { %v38_v8 = vpop.permute.xlu2 %37  }
  0x67   :  { %v45_v9 = vpop.permute.xlu2 %44  }
  0x74   :  { %v10_v10 = vpop.permute.xlu0 %9   ;;  %v24_v11 = vpop.permute.xlu1 %23  }
  0x75   :  { %12 = vst.msk [vmem:[#allocation0] sm:$0x3] %vm11_vm1, %v10_v10  }
  0x7c   :  { %v17_v12 = vpop.permute.xlu0 %16   ;;  %v31_v13 = vpop.permute.xlu1 %30  }
  0x7d   :  { %19 = vst.msk [vmem:[#allocation0] sm:$0x3] %vm18_vm2, %v17_v12  }
  0x7e   :  { %26 = vst.msk [vmem:[#allocation0] sm:$0x3] %vm25_vm3, %v24_v11  }
  0x7f   :  { %33 = vst.msk [vmem:[#allocation0] sm:$0x3] %vm32_vm4, %v31_v13  }
  0x80   :  { %40 = vst.msk [vmem:[#allocation0] sm:$0x3] %vm39_vm5, %v38_v8  }
  0x81   :  { %47 = vst.msk [vmem:[#allocation0] sm:$0x3] %vm46_vm6, %v45_v9  }
  0x84   :  { %v52_v14 = vpop.permute.xlu0 %51  }
  0x85   :  { %54 = vst.msk [vmem:[#allocation0] sm:$0x3] %vm53_vm7, %v52_v14  }
  0x8c   :  { %v57_v15 = vld [vmem:[#allocation0] sm:$0x3] }
  0x8d   :  { %60 = vst [vmem:[%s120_s1] sm:$0x3] %v57_v15 }

// kernel: cbam_pallas.1
= control target key start
LH: loop header
LB: loop body
LE: loop exit
PB: predicated region body
PF: predicated region fallthrough
CT: control target
= control target key end

     0   :  { %s1764_s29 = smov 0   ;;  %s2854_s0 = inlined_call_operand.vmem [shape: f32[16,16,256], index: 0, kind: input, shape index: {}]   ;;  %s2855_s1 = inlined_call_operand.vmem [shape: f32[16,128], index: 1, kind: input, shape index: {}]   ;;  %s2856_s2 = inlined_call_operand.vmem [shape: f32[1,128], index: 2, kind: input, shape index: {}]   ;;  %s2857_s3 = inlined_call_operand.vmem [shape: f32[128,16], index: 3, kind: input, shape index: {}]   ;;  %s2858_s4 = inlined_call_operand.vmem [shape: f32[1,16], index: 4, kind: input, shape index: {}]   ;;  %s2859_s5 = inlined_call_operand.vmem [shape: f32[256,256], index: 5, kind: input, shape index: {}]   ;;  %s2860_s6 = inlined_call_operand.vmem [shape: f32[256,256], index: 6, kind: input, shape index: {}]   ;;  %s2861_s7 = inlined_call_operand.<no memory space> [shape: f32[1], index: 7, kind: input, shape index: {}]   ;;  %s2862_s8 = inlined_call_operand.vmem [shape: f32[16,16,256], index: 8, kind: output, shape index: {}]  }
   0x1   :  { %13 = sst [smem:[#allocation2]] %s2861_s7 }
   0x2 LB: > { %s1633_s30 = sadd.s32 4294967295, %s1712_s29   ;;  %p1637_p0 = scmp.ge.s32.totalorder %s1712_s29, 1  ;;  %s1712_s29 = sphi %s1764_s29, %s19_s29  }
   0x3   : > { %p265_p1 = scmp.lt.s32.totalorder %s1712_s29, 3 }
   0x5   : > { %p266_p2 = pnand %p1637_p0, %p265_p1 }
   0x7   : > { %269 = sbr.rel (%p266_p2) target bundleno = 939 (0x3ab), region = 52 }
   0xc   : > { %s1638_s9 = sshll.u32 %s1633_s30, 3  ;;  %vm507_vm1 = vcmask 130112   ;;  %vm530_vm2 = vcmask 1041409   ;;  %vm532_vm3 = vcmask 1042434   ;;  %vm534_vm4 = vcmask 1043459   ;;  %s1409_s21 = sld [smem:[#allocation2]] }
   0xd   : > { %p302_p3 = scmp.lt.s32.totalorder %s1638_s9, 15  ;;  %vm536_vm5 = vcmask 1044484   ;;  %vm538_vm6 = vcmask 1045509   ;;  %vm540_vm7 = vcmask 1046534   ;;  %vm542_vm8 = vcmask 1047559  }
   0xe   : > { %vm594_vm9 = vcmask 130048  }
   0xf   : > { %s2915_s9 = smov (!%p302_p3, %s1638_s9), 15 }
  0x10   : > { %s1648_s7 = sshll.u32 %s2915_s9, 5 }
  0x11   : > { %s1780_s12 = scalar_lea.vmem %s2854_s0, %s1648_s7  ;;  %s2781_s24 = scalar_lea.vmem %s2862_s8, %s1648_s7 }
  0x12   : > { %v1783_v0 = vld [vmem:[%s1780_s12 + $0x40] sm:$0xff]  ;;  %v1786_v1 = vld [vmem:[%s1780_s12 + $0x48] sm:$0xff]  ;;  %v1807_v9 = vld [vmem:[%s1780_s12 + $0x50] sm:$0xff] }
  0x13   : > { %v1789_v2 = vld [vmem:[%s1780_s12 + $0x20] sm:$0xff]  ;;  %v379_v3 = vadd.f32 %v1786_v1, %v1783_v0  ;;  %v1794_v4 = vld [vmem:[%s1780_s12 + $0x28] sm:$0xff]  ;;  %v1810_v10 = vld [vmem:[%s1780_s12 + $0x58] sm:$0xff]  ;;  %v450_v50 = vmax.f32 %v1783_v0, %v1786_v1 }
  0x14   : > { %v1797_v5 = vld [vmem:[%s1780_s12] sm:$0xff]  ;;  %v1800_v6 = vld [vmem:[%s1780_s12 + $0x8] sm:$0xff]  ;;  %v373_v7 = vadd.f32 %v1794_v4, %v1789_v2  ;;  %v1813_v11 = vld [vmem:[%s1780_s12 + $0x30] sm:$0xff]  ;;  %v382_v15 = vadd.f32 %v1810_v10, %v1807_v9  ;;  %v444_v52 = vmax.f32 %v1789_v2, %v1794_v4  ;;  %v453_v55 = vmax.f32 %v1807_v9, %v1810_v10 }
  0x15   : > { %v367_v8 = vadd.f32 %v1800_v6, %v1797_v5  ;;  %380 = vadd.xlane.f32.xlu2 %v379_v3  ;;  %v1816_v12 = vld [vmem:[%s1780_s12 + $0x38] sm:$0xff]  ;;  %v1819_v13 = vld [vmem:[%s1780_s12 + $0x10] sm:$0xff]  ;;  %v331_v18 = vld [vmem:[%s1780_s12 + $0x80] sm:$0xff]  ;;  %v438_v48 = vmax.f32 %v1797_v5, %v1800_v6  ;;  %v1714_v3 = vmov 256.0  }
  0x16   : > { %374 = vadd.xlane.f32.xlu1 %v373_v7  ;;  %v1822_v14 = vld [vmem:[%s1780_s12 + $0x18] sm:$0xff]  ;;  %v376_v16 = vadd.f32 %v1816_v12, %v1813_v11  ;;  %v332_v19 = vld [vmem:[%s1780_s12 + $0x88] sm:$0xff]  ;;  %v1833_v20 = vld [vmem:[%s1780_s12 + $0x70] sm:$0xff]  ;;  %v447_v51 = vmax.f32 %v1813_v11, %v1816_v12  ;;  %1674 = vrcp.f32 %v1714_v3 }
  0x17   : > { %368 = vadd.xlane.f32.xlu0 %v367_v8  ;;  %v370_v17 = vadd.f32 %v1822_v14, %v1819_v13  ;;  %v1836_v21 = vld [vmem:[%s1780_s12 + $0x78] sm:$0xff]  ;;  %v1839_v22 = vld [vmem:[%s1780_s12 + $0x60] sm:$0xff]  ;;  %v1842_v23 = vld [vmem:[%s1780_s12 + $0x68] sm:$0xff]  ;;  %v391_v24 = vadd.f32 %v332_v19, %v331_v18  ;;  %v441_v47 = vmax.f32 %v1819_v13, %v1822_v14  ;;  %v462_v58 = vmax.f32 %v331_v18, %v332_v19 }
  0x18   : > { %v388_v25 = vadd.f32 %v1836_v21, %v1833_v20  ;;  %v385_v26 = vadd.f32 %v1842_v23, %v1839_v22  ;;  %v337_v27 = vld [vmem:[%s1780_s12 + $0xb0] sm:$0xff]  ;;  %v338_v28 = vld [vmem:[%s1780_s12 + $0xb8] sm:$0xff]  ;;  %v335_v29 = vld [vmem:[%s1780_s12 + $0xa0] sm:$0xff]  ;;  %v459_v53 = vmax.f32 %v1833_v20, %v1836_v21  ;;  %v456_v54 = vmax.f32 %v1839_v22, %v1842_v23 }
  0x19   : > { %v336_v30 = vld [vmem:[%s1780_s12 + $0xa8] sm:$0xff]  ;;  %v333_v31 = vld [vmem:[%s1780_s12 + $0x90] sm:$0xff]  ;;  %v334_v32 = vld [vmem:[%s1780_s12 + $0x98] sm:$0xff]  ;;  %v400_v33 = vadd.f32 %v338_v28, %v337_v27  ;;  %v471_v61 = vmax.f32 %v337_v27, %v338_v28 }
  0x1a   : > { %v397_v34 = vadd.f32 %v336_v30, %v335_v29  ;;  %v394_v35 = vadd.f32 %v334_v32, %v333_v31  ;;  %v343_v36 = vld [vmem:[%s1780_s12 + $0xe0] sm:$0xff]  ;;  %v344_v37 = vld [vmem:[%s1780_s12 + $0xe8] sm:$0xff]  ;;  %v341_v38 = vld [vmem:[%s1780_s12 + $0xd0] sm:$0xff]  ;;  %v468_v56 = vmax.f32 %v335_v29, %v336_v30  ;;  %v465_v57 = vmax.f32 %v333_v31, %v334_v32 }
  0x1b   : > { %v342_v39 = vld [vmem:[%s1780_s12 + $0xd8] sm:$0xff]  ;;  %v339_v40 = vld [vmem:[%s1780_s12 + $0xc0] sm:$0xff]  ;;  %v340_v41 = vld [vmem:[%s1780_s12 + $0xc8] sm:$0xff]  ;;  %v409_v42 = vadd.f32 %v344_v37, %v343_v36  ;;  %v480_v63 = vmax.f32 %v343_v36, %v344_v37  ;;  %v502_v32 = vlaneseq }
  0x1c   : > { %v406_v43 = vadd.f32 %v342_v39, %v341_v38  ;;  %v403_v44 = vadd.f32 %v340_v41, %v339_v40  ;;  %v345_v45 = vld [vmem:[%s1780_s12 + $0xf0] sm:$0xff]  ;;  %v346_v46 = vld [vmem:[%s1780_s12 + $0xf8] sm:$0xff]  ;;  %v477_v59 = vmax.f32 %v341_v38, %v342_v39  ;;  %v474_v60 = vmax.f32 %v339_v40, %v340_v41  ;;  %v347_v27 = vld [vmem:[%s2855_s1] sm:$0xff] }
  0x1d   : > { %383 = vadd.xlane.f32.xlu2 %v382_v15  ;;  %v412_v49 = vadd.f32 %v346_v46, %v345_v45  ;;  %v483_v62 = vmax.f32 %v345_v45, %v346_v46 }
  0x1e   : > { %377 = vadd.xlane.f32.xlu1 %v376_v16  ;;  %v1675_v16 = vpop.eup %1674 }
  0x1f   : > { %371 = vadd.xlane.f32.xlu0 %v370_v17  ;;  %v416_v17 = vmul.f32 256.0, %v1675_v16  ;;  %vm420_vm0 = vweird.f32 %v1675_v16 }
  0x25   : > { %392 = vadd.xlane.f32.xlu2 %v391_v24 }
  0x26   : > { %389 = vadd.xlane.f32.xlu1 %v388_v25  ;;  %v417_v25 = vsub.f32 1.0, %v416_v17 }
  0x27   : > { %386 = vadd.xlane.f32.xlu0 %v385_v26  ;;  %v348_v26 = vld [vmem:[%s2855_s1 + $0x8] sm:$0xff] }
  0x28   : > { %613 = vmatpush.msra.mxu0 %v348_v26  ;;  %v418_v28 = vmul.f32 %v1675_v16, %v417_v25 }
  0x2a   : > { %614 = vmatpush.msra.mxu0 %v347_v27 }
  0x2d   : > { %401 = vadd.xlane.f32.xlu2 %v400_v33  ;;  %v419_v33 = vadd.f32 %v1675_v16, %v418_v28 }
  0x2e   : > { %398 = vadd.xlane.f32.xlu1 %v397_v34  ;;  %v1885_v34 = vand.u32 127, %v502_v32 }
  0x2f   : > { %395 = vadd.xlane.f32.xlu0 %v394_v35  ;;  %v421_v35 = vsel %vm420_vm0, %v1675_v16, %v419_v33 }
  0x30   : > { %v1888_v37 = vadd.s32 4294967288, %v1885_v34 }
  0x35   : > { %410 = vadd.xlane.f32.xlu2 %v409_v42 }
  0x36   : > { %407 = vadd.xlane.f32.xlu1 %v406_v43 }
  0x37   : > { %404 = vadd.xlane.f32.xlu0 %v403_v44 }
  0x3d   : > { %442 = vmax.xlane.f32.xlu2 %v441_v47 }
  0x3e   : > { %439 = vmax.xlane.f32.xlu1 %v438_v48 }
  0x3f   : > { %413 = vadd.xlane.f32.xlu0 %v412_v49 }
  0x45   : > { %451 = vmax.xlane.f32.xlu2 %v450_v50 }
  0x46   : > { %448 = vmax.xlane.f32.xlu1 %v447_v51 }
  0x47   : > { %445 = vmax.xlane.f32.xlu0 %v444_v52 }
  0x4d   : > { %460 = vmax.xlane.f32.xlu2 %v459_v53 }
  0x4e   : > { %457 = vmax.xlane.f32.xlu1 %v456_v54 }
  0x4f   : > { %454 = vmax.xlane.f32.xlu0 %v453_v55 }
  0x55   : > { %469 = vmax.xlane.f32.xlu2 %v468_v56 }
  0x56   : > { %466 = vmax.xlane.f32.xlu1 %v465_v57 }
  0x57   : > { %463 = vmax.xlane.f32.xlu0 %v462_v58 }
  0x5d   : > { %478 = vmax.xlane.f32.xlu2 %v477_v59 }
  0x5e   : > { %475 = vmax.xlane.f32.xlu1 %v474_v60 }
  0x5f   : > { %472 = vmax.xlane.f32.xlu0 %v471_v61 }
  0x66   : > { %484 = vmax.xlane.f32.xlu1 %v483_v62 }
  0x67   : > { %481 = vmax.xlane.f32.xlu0 %v480_v63 }
  0x88   : > { %v381_v7 = vpop.xlane.xlu2 %380 }
  0x89   : > { %v375_v8 = vpop.xlane.xlu1 %374  ;;  %v426_v44 = vmul.f32 %v421_v35, %v381_v7 }
  0x8a   : > { %v369_v15 = vpop.xlane.xlu0 %368  ;;  %v424_v42 = vmul.f32 %v421_v35, %v375_v8 }
  0x8b   : > { %v422_v43 = vmul.f32 %v421_v35, %v369_v15  ;;  %v512_v55 = vperm.slane %v426_v44, %v1885_v34 }
  0x8c   : > { %v509_v50 = vperm.slane %v424_v42, %v1885_v34 }
  0x8d   : > { %v504_v51 = vperm.slane %v422_v43, %v1885_v34 }
  0x90   : > { %v384_v18 = vpop.xlane.xlu2 %383 }
  0x91   : > { %v378_v19 = vpop.xlane.xlu1 %377  ;;  %v427_v45 = vmul.f32 %v421_v35, %v384_v18 }
  0x92   : > { %v372_v24 = vpop.xlane.xlu0 %371  ;;  %v425_v38 = vmul.f32 %v421_v35, %v378_v19 }
  0x93   : > { %v423_v39 = vmul.f32 %v421_v35, %v372_v24  ;;  %v513_v56 = vperm.slane %v427_v45, %v1888_v37 }
  0x94   : > { %v510_v46 = vperm.slane %v425_v38, %v1888_v37 }
  0x95   : > { %v506_v47 = vperm.slane %v423_v39, %v1888_v37  ;;  %v514_v17 = vsel %vm507_vm1, %v513_v56, %v512_v55 }
  0x96   : > { %v511_v57 = vsel %vm507_vm1, %v510_v46, %v509_v50 }
  0x97   : > { %v508_v58 = vsel %vm507_vm1, %v506_v47, %v504_v51  ;;  %v365_v51 = vld [vmem:[%s2857_s3 + $0x78] sm:$0xff] }
  0x98   : > { %v393_v29 = vpop.xlane.xlu2 %392  ;;  %v531_v18 = vsel %vm530_vm2, %v511_v57, %v508_v58  ;;  %627 = vmatpush.msra.mxu1 %v365_v51  ;;  %v362_v57 = vld [vmem:[%s2857_s3 + $0x60] sm:$0xff]  ;;  %v361_v58 = vld [vmem:[%s2857_s3 + $0x58] sm:$0xff] }
  0x99   : > { %v390_v30 = vpop.xlane.xlu1 %389  ;;  %v430_v52 = vmul.f32 %v421_v35, %v393_v29 }
  0x9a   : > { %v387_v31 = vpop.xlane.xlu0 %386  ;;  %v429_v48 = vmul.f32 %v421_v35, %v390_v30  ;;  %v533_v30 = vsel %vm532_vm3, %v514_v17, %v531_v18 }
  0x9b   : > { %v428_v49 = vmul.f32 %v421_v35, %v387_v31  ;;  %v518_v7 = vperm.slane %v430_v52, %v1885_v34  ;;  %v364_v52 = vld [vmem:[%s2857_s3 + $0x70] sm:$0xff] }
  0x9c   : > { %v516_v61 = vperm.slane %v429_v48, %v1888_v37  ;;  %628 = vmatpush.msra.mxu1 %v364_v52 }
  0x9d   : > { %v515_v62 = vperm.slane %v428_v49, %v1885_v34 }
  0x9f   : > { %v517_v19 = vsel %vm507_vm1, %v516_v61, %v515_v62  ;;  %v359_v61 = vld [vmem:[%s2857_s3 + $0x48] sm:$0xff] }
  0xa0   : > { %v402_v36 = vpop.xlane.xlu2 %401  ;;  %v535_v33 = vsel %vm534_vm4, %v517_v19, %v533_v30 }
  0xa1   : > { %v399_v40 = vpop.xlane.xlu1 %398  ;;  %v433_v63 = vmul.f32 %v421_v35, %v402_v36 }
  0xa2   : > { %v396_v41 = vpop.xlane.xlu0 %395  ;;  %v432_v3 = vmul.f32 %v421_v35, %v399_v40 }
  0xa3   : > { %v431_v53 = vmul.f32 %v421_v35, %v396_v41  ;;  %v522_v24 = vperm.slane %v433_v63, %v1888_v37 }
  0xa4   : > { %v521_v25 = vperm.slane %v432_v3, %v1885_v34  ;;  %v358_v3 = vld [vmem:[%s2857_s3 + $0x40] sm:$0xff] }
  0xa5   : > { %v519_v8 = vperm.slane %v431_v53, %v1888_v37 }
  0xa6   : > { %v523_v39 = vsel %vm507_vm1, %v522_v24, %v521_v25  ;;  %v356_v24 = vld [vmem:[%s2857_s3 + $0x30] sm:$0xff] }
  0xa7   : > { %v520_v27 = vsel %vm507_vm1, %v519_v8, %v518_v7 }
  0xa8   : > { %v411_v54 = vpop.xlane.xlu2 %410  ;;  %v537_v42 = vsel %vm536_vm5, %v520_v27, %v535_v33 }
  0xa9   : > { %v408_v59 = vpop.xlane.xlu1 %407  ;;  %v436_v26 = vmul.f32 %v421_v35, %v411_v54  ;;  %v539_v45 = vsel %vm538_vm6, %v523_v39, %v537_v42  ;;  %v363_v54 = vld [vmem:[%s2857_s3 + $0x68] sm:$0xff]  ;;  %v354_v42 = vld [vmem:[%s2857_s3 + $0x20] sm:$0xff] }
  0xaa   : > { %v405_v60 = vpop.xlane.xlu0 %404  ;;  %v435_v15 = vmul.f32 %v421_v35, %v408_v59  ;;  %629 = vmatpush.msra.mxu1 %v363_v54  ;;  %v360_v59 = vld [vmem:[%s2857_s3 + $0x50] sm:$0xff] }
  0xab   : > { %v434_v16 = vmul.f32 %v421_v35, %v405_v60  ;;  %v527_v40 = vperm.slane %v436_v26, %v1885_v34 }
  0xac   : > { %v525_v28 = vperm.slane %v435_v15, %v1888_v37  ;;  %630 = vmatpush.msra.mxu1 %v362_v57  ;;  %v357_v15 = vld [vmem:[%s2857_s3 + $0x38] sm:$0xff] }
  0xad   : > { %v524_v29 = vperm.slane %v434_v16, %v1885_v34 }
  0xae   : > { %631 = vmatpush.msra.mxu1 %v361_v58 }
  0xaf   : > { %v526_v43 = vsel %vm507_vm1, %v525_v28, %v524_v29  ;;  %v355_v28 = vld [vmem:[%s2857_s3 + $0x28] sm:$0xff] }
  0xb0   : > { %v1911_v31 = vpop.xlane.xlu2 %442  ;;  %v541_v47 = vsel %vm540_vm7, %v526_v43, %v539_v45  ;;  %632 = vmatpush.msra.mxu1 %v360_v59 }
  0xb1   : > { %v1914_v36 = vpop.xlane.xlu1 %439  ;;  %v561_v18 = vperm.slane %v1911_v31, %v1888_v37 }
  0xb2   : > { %v414_v38 = vpop.xlane.xlu0 %413  ;;  %633 = vmatpush.msra.mxu1 %v359_v61  ;;  %v560_v19 = vperm.slane %v1914_v36, %v1885_v34  ;;  %v352_v61 = vld [vmem:[%s2857_s3 + $0x10] sm:$0xff] }
  0xb3   : > { %v437_v41 = vmul.f32 %v421_v35, %v414_v38 }
  0xb4   : > { %634 = vmatpush.msra.mxu1 %v358_v3  ;;  %v562_v38 = vsel %vm507_vm1, %v561_v18, %v560_v19  ;;  %v1673_v18 = vld [vmem:[%s2858_s4] ss:$0 sm:$0xff]  ;;  %v2015_v19 = vshrl.u32 %v502_v32, 7 }
  0xb5   : > { %v528_v44 = vperm.slane %v437_v41, %v1888_v37 }
  0xb6   : > { %635 = vmatpush.msra.mxu1 %v357_v15  ;;  %1662 = vset.pattern.permute.xlu1 %v2015_v19 }
  0xb7   : > { %v529_v46 = vsel %vm507_vm1, %v528_v44, %v527_v40  ;;  %1660 = vset.pattern.permute.xlu2 %v2015_v19 }
  0xb8   : > { %v543_v48 = vsel %vm542_vm8, %v529_v46, %v541_v47  ;;  %v452_v35 = vpop.xlane.xlu2 %451  ;;  %636 = vmatpush.msra.mxu1 %v356_v24  ;;  %v353_v46 = vld [vmem:[%s2857_s3 + $0x18] sm:$0xff] }
  0xb9   : > { %1644 = vmatmul.msk.f32.vlgmr.msra.gmra.mxu0 %vm594_vm9, %v543_v48  ;;  %v449_v49 = vpop.xlane.xlu1 %448  ;;  %v566_v16 = vperm.slane %v452_v35, %v1885_v34 }
  0xba   : > { %v446_v50 = vpop.xlane.xlu0 %445  ;;  %v564_v7 = vperm.slane %v449_v49, %v1888_v37  ;;  %637 = vmatpush.msra.mxu1 %v355_v28 }
  0xbb   : > { %v563_v8 = vperm.slane %v446_v50, %v1885_v34 }
  0xbc   : > { %638 = vmatpush.msra.mxu1 %v354_v42 }
  0xbd   : > { %v565_v25 = vsel %vm507_vm1, %v564_v7, %v563_v8 }
  0xbe   : > { %v584_v43 = vsel %vm530_vm2, %v565_v25, %v562_v38  ;;  %639 = vmatpush.msra.mxu1 %v353_v46  ;;  %v683_v25 = vadd.s32 8, %v2015_v19 }
  0xc0   : > { %v461_v53 = vpop.xlane.xlu2 %460  ;;  %640 = vmatpush.msra.mxu1 %v352_v61  ;;  %1661 = vset.pattern.permute.xlu0 %v683_v25 }
  0xc1   : > { %v458_v55 = vpop.xlane.xlu1 %457  ;;  %v570_v26 = vperm.slane %v461_v53, %v1888_v37 }
  0xc2   : > { %v455_v56 = vpop.xlane.xlu0 %454  ;;  %v569_v27 = vperm.slane %v458_v55, %v1885_v34 }
  0xc3   : > { %v567_v17 = vperm.slane %v455_v56, %v1888_v37 }
  0xc4   : > { %v571_v44 = vsel %vm507_vm1, %v570_v26, %v569_v27 }
  0xc5   : > { %v568_v29 = vsel %vm507_vm1, %v567_v17, %v566_v16 }
  0xc6   : > { %v585_v45 = vsel %vm532_vm3, %v568_v29, %v584_v43 }
  0xc7   : > { %v586_v50 = vsel %vm534_vm4, %v571_v44, %v585_v45 }
  0xc8   : > { %v470_v60 = vpop.xlane.xlu2 %469 }
  0xc9   : > { %v467_v62 = vpop.xlane.xlu1 %466  ;;  %v575_v39 = vperm.slane %v470_v60, %v1885_v34 }
  0xca   : > { %v464_v63 = vpop.xlane.xlu0 %463  ;;  %v573_v30 = vperm.slane %v467_v62, %v1888_v37  ;;  %v351_v62 = vld [vmem:[%s2857_s3 + $0x8] sm:$0xff] }
  0xcb   : > { %v572_v31 = vperm.slane %v464_v63, %v1885_v34  ;;  %641 = vmatpush.msra.mxu1 %v351_v62 }
  0xcd   : > { %v574_v47 = vsel %vm507_vm1, %v573_v30, %v572_v31 }
  0xce   : > { %v587_v51 = vsel %vm536_vm5, %v574_v47, %v586_v50 }
  0xd0   : > { %v479_v40 = vpop.xlane.xlu2 %478 }
  0xd1   : > { %v476_v33 = vpop.xlane.xlu1 %475  ;;  %v579_v48 = vperm.slane %v479_v40, %v1888_v37 }
  0xd2   : > { %v473_v36 = vpop.xlane.xlu0 %472  ;;  %v578_v35 = vperm.slane %v476_v33, %v1885_v34 }
  0xd3   : > { %v576_v41 = vperm.slane %v473_v36, %v1888_v37 }
  0xd4   : > { %v580_v52 = vsel %vm507_vm1, %v579_v48, %v578_v35 }
  0xd5   : > { %v577_v49 = vsel %vm507_vm1, %v576_v41, %v575_v39 }
  0xd6   : > { %v588_v55 = vsel %vm538_vm6, %v577_v49, %v587_v51 }
  0xd7   : > { %v589_v59 = vsel %vm540_vm7, %v580_v52, %v588_v55 }
  0xd9   : > { %v485_v53 = vpop.xlane.xlu1 %484 }
  0xda   : > { %v482_v54 = vpop.xlane.xlu0 %481  ;;  %v582_v56 = vperm.slane %v485_v53, %v1888_v37  ;;  %v1672_v37 = vld [vmem:[%s2856_s2] ss:$0 sm:$0xff] }
  0xdb   : > { %v581_v57 = vperm.slane %v482_v54, %v1885_v34  ;;  %v350_v34 = vld [vmem:[%s2857_s3] sm:$0xff] }
  0xdc   : > { %642 = vmatpush.msra.mxu1 %v350_v34 }
  0xdd   : > { %v583_v58 = vsel %vm507_vm1, %v582_v56, %v581_v57 }
  0xde   : > { %v590_v60 = vsel %vm542_vm8, %v583_v58, %v589_v59  ;;  %v1715_v58 = vmov 16.0  }
  0xdf   : > { %1645 = vmatmul.msk.f32.gmra.mxu0 %vm594_vm9, %v590_v60 }
 0x136   : > { %v616_v63 = vpop.f32.mrf.mxu0 }
 0x137   : > { %v617_v3 = vadd.f32 %v1672_v37, %v616_v63 }
 0x139   : > { %v622_v7 = vmax.f32 %v617_v3, 0.0 }
 0x13b   : > { %643 = vmatmul.f32.vlgmr.msra.gmra.mxu1 %v622_v7 }
 0x15c   : > { %v619_v8 = vpop.f32.mrf.mxu0 }
 0x15d   : > { %v620_v15 = vadd.f32 %v1672_v37, %v619_v8 }
 0x15f   : > { %v623_v16 = vmax.f32 %v620_v15, 0.0 }
 0x161   : > { %646 = vmatmul.f32.gmra.mxu1 %v623_v16 }
 0x1b8   : > { %v644_v17 = vpop.f32.mrf.mxu1 }
 0x1b9   : > { %v645_v26 = vadd.f32 %v1673_v18, %v644_v17  ;;  %v1149_v17 = vld [vmem:[%s2860_s6 + $0xe0] sm:$0xff] }
 0x1de   : > { %v647_v24 = vpop.f32.mrf.mxu1 }
 0x1df   : > { %v648_v27 = vadd.f32 %v1673_v18, %v647_v24  ;;  %v1181_v18 = vld [vmem:[%s2860_s6 + $0x1e0] sm:$0xff]  ;;  %v1182_v24 = vld [vmem:[%s2860_s6 + $0x1e8] sm:$0xff] }
 0x1e1   : > { %v650_v28 = vadd.f32 %v648_v27, %v645_v26 }
 0x1e3   : > { %v651_v29 = vand.u32 2147483647, %v650_v28  ;;  %vm655_vm14 = vcmp.ge.f32.partialorder %v650_v28, 0.0 }
 0x1e5   : > { %v652_v30 = vsub.f32 0.0, %v651_v29  ;;  %v1147_v29 = vld [vmem:[%s2860_s6 + $0xd0] sm:$0xff] }
 0x1e7   : > { %v653_v31 = vmul.f32 1.442695, %v652_v30  ;;  %v1179_v30 = vld [vmem:[%s2860_s6 + $0x1d0] sm:$0xff] }
 0x1e9   : > { %1676 = vpow2.f32 %v653_v31  ;;  %v1148_v31 = vld [vmem:[%s2860_s6 + $0xd8] sm:$0xff] }
 0x1ef   : > { %v1677_v33 = vpop.eup %1676 }
 0x1f0   : > { %v656_v36 = vadd.f32 1.0, %v1677_v33 }
 0x1f2   : > { %1678 = vrcp.f32 %v656_v36  ;;  %v668_v40 = vand.u32 2147483648, %v656_v36  ;;  %v666_v42 = vand.u32 2147483647, %v656_v36  ;;  %vm662_vm11 = vweird.f32 %v656_v36 }
 0x1f3   : > { %1680 = vrcp.f32 %v1715_v58 }
 0x1f4   : > { %v669_v44 = vor.u32 1.1754944e-38, %v668_v40  ;;  %vm667_vm13 = vcmp.eq.f32.partialorder %v666_v42, 8.507059e+37  ;;  %v1177_v42 = vld [vmem:[%s2860_s6 + $0x1c0] sm:$0xff] }
 0x1f8   : > { %v1679_v32 = vpop.eup %1678 }
 0x1f9   : > { %v658_v38 = vmul.f32 %v1679_v32, %v656_v36  ;;  %vm663_vm10 = vweird.f32 %v1679_v32  ;;  %v2064_v8 = vpop.eup %1680 }
 0x1fa   : > { %vm664_vm12 = vmor %vm662_vm11, %vm663_vm10  ;;  %vm927_vm15 = vweird.f32 %v2064_v8 }
 0x1fb   : > { %v659_v39 = vsub.f32 1.0, %v658_v38 }
 0x1fd   : > { %v660_v41 = vmul.f32 %v1679_v32, %v659_v39 }
 0x1ff   : > { %v661_v43 = vadd.f32 %v1679_v32, %v660_v41  ;;  %v1145_v41 = vld [vmem:[%s2860_s6 + $0xc0] sm:$0xff] }
 0x201   : > { %v665_v45 = vsel %vm664_vm12, %v1679_v32, %v661_v43  ;;  %v1180_v32 = vld [vmem:[%s2860_s6 + $0x1d8] sm:$0xff]  ;;  %v1146_v43 = vld [vmem:[%s2860_s6 + $0xc8] sm:$0xff] }
 0x202   : > { %v670_v46 = vsel %vm667_vm13, %v669_v44, %v665_v45 }
 0x203   : > { %v672_v47 = vmul.f32 %v1677_v33, %v670_v46  ;;  %v923_v33 = vmul.f32 16.0, %v2064_v8 }
 0x205   : > { %v673_v48 = vsel %vm655_vm14, %v670_v46, %v672_v47 }
 0x206   : > { %v687_v35 = vperm.slane %v673_v48, 1  ;;  %v674_v49 = vperm.slane %v673_v48, 0  ;;  %v700_v50 = vperm.slane %v673_v48, 2  ;;  %v726_v51 = vperm.slane %v673_v48, 4 }
 0x207   : > { %v713_v52 = vperm.slane %v673_v48, 3  ;;  %v752_v53 = vperm.slane %v673_v48, 6  ;;  %v739_v54 = vperm.slane %v673_v48, 5  ;;  %v765_v55 = vperm.slane %v673_v48, 7  ;;  %v1178_v48 = vld [vmem:[%s2860_s6 + $0x1c8] sm:$0xff] }
 0x208   : > { %692 = vperm.xlu1 %1662, %v687_v35   ;;  %685 = vperm.xlu0 %1661, %v674_v49  }
 0x209   : > { %679 = vperm.xlu2 %1660, %v674_v49   ;;  %v924_v49 = vsub.f32 1.0, %v923_v33 }
 0x210   : > { %1665 = vset.pattern.permute.xlu1 %v683_v25  ;;  %1666 = vset.pattern.permute.xlu0 %v2015_v19 }
 0x211   : > { %1663 = vset.pattern.permute.xlu2 %v683_v25 }
 0x218   : > { %711 = vperm.xlu1 %1665, %v700_v50   ;;  %731 = vperm.xlu0 %1666, %v726_v51  }
 0x219   : > { %698 = vperm.xlu2 %1663, %v687_v35   ;;  %v1143_v35 = vld [vmem:[%s2860_s6 + $0xb0] sm:$0xff] }
 0x220   : > { %724 = vperm.xlu1 %1665, %v713_v52   ;;  %1669 = vset.pattern.permute.xlu0 %v683_v25 }
 0x221   : > { %1664 = vset.pattern.permute.xlu2 %v2015_v19 }
 0x228   : > { %1668 = vset.pattern.permute.xlu1 %v2015_v19  ;;  %763 = vperm.xlu0 %1669, %v752_v53  }
 0x229   : > { %705 = vperm.xlu2 %1664, %v700_v50  }
 0x230   : > { %744 = vperm.xlu1 %1668, %v739_v54  }
 0x231   : > { %718 = vperm.xlu2 %1664, %v713_v52  }
 0x238   : > { %757 = vperm.xlu1 %1668, %v752_v53  }
 0x239   : > { %1667 = vset.pattern.permute.xlu2 %v683_v25 }
 0x240   : > { %1671 = vset.pattern.permute.xlu1 %v683_v25 }
 0x241   : > { %737 = vperm.xlu2 %1667, %v726_v51   ;;  %v1175_v51 = vld [vmem:[%s2860_s6 + $0x1b0] sm:$0xff] }
 0x248   : > { %776 = vperm.xlu1 %1671, %v765_v55  }
 0x249   : > { %750 = vperm.xlu2 %1667, %v739_v54  }
 0x251   : > { %1670 = vset.pattern.permute.xlu2 %v2015_v19  ;;  %v1150_v19 = vld [vmem:[%s2860_s6 + $0xe8] sm:$0xff] }
 0x259   : > { %770 = vperm.xlu2 %1670, %v765_v55   ;;  %v1144_v55 = vld [vmem:[%s2860_s6 + $0xb8] sm:$0xff] }
 0x263   : > { %v680_v56 = vpop.permute.xlu2 %679 }
 0x264   : > { %v2040_v3 = vmul.f32 %v680_v56, %v1797_v5  ;;  %v2057_v5 = vmul.f32 %v680_v56, %v1800_v6  ;;  %v1176_v56 = vld [vmem:[%s2860_s6 + $0x1b8] sm:$0xff] }
 0x273   : > { %v699_v57 = vpop.permute.xlu2 %698 }
 0x274   : > { %v2025_v61 = vmul.f32 %v699_v57, %v1813_v11  ;;  %v2037_v63 = vmul.f32 %v699_v57, %v1816_v12  ;;  %v1152_v12 = vld [vmem:[%s2860_s6 + $0xf8] sm:$0xff] }
 0x275   : > { %1257 = vmatpush.msrb.mxu0 %v1152_v12 }
 0x277   : > { %1258 = vmatpush.msrb.mxu0 %v1150_v19 }
 0x279   : > { %1259 = vmatpush.msrb.mxu0 %v1148_v31 }
 0x27a   : > { %v693_v59 = vpop.permute.xlu1 %692  ;;  %v686_v60 = vpop.permute.xlu0 %685 }
 0x27b   : > { %v2028_v62 = vmul.f32 %v693_v59, %v1789_v2  ;;  %v2031_v34 = vmul.f32 %v693_v59, %v1794_v4  ;;  %v2034_v37 = vmul.f32 %v686_v60, %v1819_v13  ;;  %v2045_v11 = vmul.f32 %v686_v60, %v1822_v14  ;;  %v1151_v2 = vld [vmem:[%s2860_s6 + $0xf0] sm:$0xff]  ;;  %v1184_v14 = vld [vmem:[%s2860_s6 + $0x1f8] sm:$0xff]  ;;  %1260 = vmatpush.msrb.mxu0 %v1146_v43 }
 0x27c   : > { %v1183_v4 = vld [vmem:[%s2860_s6 + $0x1f0] sm:$0xff]  ;;  %1217 = vmatpush.msra.mxu2 %v1151_v2  ;;  %1277 = vmatpush.msrb.mxu1 %v1184_v14  ;;  %v1141_v2 = vld [vmem:[%s2860_s6 + $0xa0] sm:$0xff] }
 0x27d   : > { %v824_v7 = vadd.f32 %v2025_v61, %v2028_v62  ;;  %v831_v13 = vadd.f32 %v2037_v63, %v2031_v34  ;;  %v959_v15 = vmax.f32 %v2028_v62, %v2025_v61  ;;  %v966_v16 = vmax.f32 %v2031_v34, %v2037_v63  ;;  %1237 = vmatpush.msra.mxu3 %v1183_v4 }
 0x27e   : > { %v810_v6 = vadd.f32 %v2034_v37, %v2040_v3  ;;  %1218 = vmatpush.msra.mxu2 %v1149_v17  ;;  %v817_v26 = vadd.f32 %v2045_v11, %v2057_v5  ;;  %v945_v27 = vmax.f32 %v2040_v3, %v2034_v37  ;;  %v952_v28 = vmax.f32 %v2057_v5, %v2045_v11  ;;  %v1142_v17 = vld [vmem:[%s2860_s6 + $0xa8] sm:$0xff] }
 0x27f   : > { %v825_v25 = vrot.slane %v824_v7, 4  ;;  %1238 = vmatpush.msra.mxu3 %v1181_v18  ;;  %v832_v36 = vrot.slane %v831_v13, 4  ;;  %v960_v38 = vrot.slane %v959_v15, 4  ;;  %v967_v39 = vrot.slane %v966_v16, 4  ;;  %1278 = vmatpush.msrb.mxu1 %v1182_v24 }
 0x280   : > { %v811_v40 = vrot.slane %v810_v6, 4  ;;  %1219 = vmatpush.msra.mxu2 %v1147_v29  ;;  %v818_v45 = vrot.slane %v817_v26, 4  ;;  %v946_v46 = vrot.slane %v945_v27, 4  ;;  %v953_v47 = vrot.slane %v952_v28, 4  ;;  %1261 = vmatpush.msrb.mxu0 %v1144_v55 }
 0x281   : > { %1239 = vmatpush.msra.mxu3 %v1179_v30  ;;  %v826_v44 = vadd.f32 %v825_v25, %v824_v7  ;;  %1279 = vmatpush.msrb.mxu1 %v1180_v32  ;;  %v833_v50 = vadd.f32 %v832_v36, %v831_v13  ;;  %v961_v52 = vmax.f32 %v959_v15, %v960_v38  ;;  %v1173_v13 = vld [vmem:[%s2860_s6 + $0x1a0] sm:$0xff]  ;;  %v1172_v32 = vld [vmem:[%s2860_s6 + $0x198] sm:$0xff] }
 0x282   : > { %1220 = vmatpush.msra.mxu2 %v1145_v41  ;;  %v2121_v53 = vmax.f32 %v966_v16, %v967_v39  ;;  %v812_v54 = vadd.f32 %v811_v40, %v810_v6  ;;  %v819_v58 = vadd.f32 %v818_v45, %v817_v26  ;;  %v947_v59 = vmax.f32 %v945_v27, %v946_v46  ;;  %v1174_v26 = vld [vmem:[%s2860_s6 + $0x1a8] sm:$0xff]  ;;  %v1139_v27 = vld [vmem:[%s2860_s6 + $0x90] sm:$0xff]  ;;  %v1137_v38 = vld [vmem:[%s2860_s6 + $0x80] sm:$0xff] }
 0x283   : > { %1240 = vmatpush.msra.mxu3 %v1177_v42  ;;  %1280 = vmatpush.msrb.mxu1 %v1178_v48  ;;  %v827_v57 = vrot.slane %v826_v44, 2  ;;  %v954_v60 = vmax.f32 %v952_v28, %v953_v47  ;;  %v706_v7 = vpop.permute.xlu2 %705  ;;  %v925_v4 = vmul.f32 %v2064_v8, %v924_v49  ;;  %v834_v14 = vrot.slane %v833_v50, 2  ;;  %v1169_v42 = vld [vmem:[%s2860_s6 + $0x180] sm:$0xff]  ;;  %v1138_v47 = vld [vmem:[%s2860_s6 + $0x88] sm:$0xff] }
 0x284   : > { %1221 = vmatpush.msra.mxu2 %v1143_v35  ;;  %v962_v15 = vrot.slane %v961_v52, 2  ;;  %v969_v16 = vrot.slane %v2121_v53, 2  ;;  %v813_v6 = vrot.slane %v812_v54, 2  ;;  %v2141_v18 = vmul.f32 %v706_v7, %v1783_v0  ;;  %1262 = vmatpush.msrb.mxu0 %v1142_v17  ;;  %v1170_v48 = vld [vmem:[%s2860_s6 + $0x188] sm:$0xff] }
 0x285   : > { %1241 = vmatpush.msra.mxu3 %v1175_v51  ;;  %1281 = vmatpush.msrb.mxu1 %v1176_v56  ;;  %v2144_v19 = vmul.f32 %v706_v7, %v1786_v1  ;;  %v2158_v0 = vadd.f32 %v827_v57, %v826_v44  ;;  %v820_v28 = vrot.slane %v819_v58, 2  ;;  %v948_v1 = vrot.slane %v947_v59, 2  ;;  %v1167_v51 = vld [vmem:[%s2860_s6 + $0x170] sm:$0xff] }
 0x286   : > { %1222 = vmatpush.msra.mxu2 %v1141_v2  ;;  %v955_v29 = vrot.slane %v954_v60, 2  ;;  %v926_v39 = vadd.f32 %v2064_v8, %v925_v4  ;;  %v835_v40 = vadd.f32 %v834_v14, %v833_v50  ;;  %v963_v41 = vmax.f32 %v961_v52, %v962_v15  ;;  %v1135_v50 = vld [vmem:[%s2860_s6 + $0x70] sm:$0xff]  ;;  %v1165_v15 = vld [vmem:[%s2860_s6 + $0x160] sm:$0xff] }
 0x287   : > { %1242 = vmatpush.msra.mxu3 %v1173_v13  ;;  %1282 = vmatpush.msrb.mxu1 %v1174_v26  ;;  %v814_v35 = vadd.f32 %v813_v6, %v812_v54  ;;  %v821_v49 = vadd.f32 %v820_v28, %v819_v58  ;;  %v829_v52 = vrot.slane %v2158_v0, 1  ;;  %v970_v55 = vmax.f32 %v2121_v53, %v969_v16  ;;  %v1136_v54 = vld [vmem:[%s2860_s6 + $0x78] sm:$0xff]  ;;  %v1166_v28 = vld [vmem:[%s2860_s6 + $0x168] sm:$0xff] }
 0x288   : > { %1223 = vmatpush.msra.mxu2 %v1139_v27  ;;  %v949_v56 = vmax.f32 %v947_v59, %v948_v1  ;;  %v956_v57 = vmax.f32 %v954_v60, %v955_v29  ;;  %v2205_v58 = vsel %vm927_vm15, %v2064_v8, %v926_v39  ;;  %v836_v2 = vrot.slane %v835_v40, 1  ;;  %v1168_v53 = vld [vmem:[%s2860_s6 + $0x178] sm:$0xff]  ;;  %v1133_v8 = vld [vmem:[%s2860_s6 + $0x60] sm:$0xff]  ;;  %v1134_v27 = vld [vmem:[%s2860_s6 + $0x68] sm:$0xff] }
 0x289   : > { %1283 = vmatpush.msrb.mxu1 %v1172_v32  ;;  %v964_v59 = vrot.slane %v963_v41, 1  ;;  %v815_v16 = vrot.slane %v814_v35, 1  ;;  %v822_v6 = vrot.slane %v821_v49, 1  ;;  %v830_v1 = vadd.f32 %v829_v52, %v2158_v0  ;;  %v1163_v0 = vld [vmem:[%s2860_s6 + $0x150] sm:$0xff] }
 0x28a   : > { %v712_v12 = vpop.permute.xlu1 %711  ;;  %1224 = vmatpush.msra.mxu2 %v1137_v38  ;;  %v971_v29 = vrot.slane %v970_v55, 1  ;;  %vm1462_vm15 = vcmask 1040384  }
 0x28b   : > { %v2147_v24 = vmul.f32 %v712_v12, %v1807_v9  ;;  %v2150_v25 = vmul.f32 %v712_v12, %v1810_v10  ;;  %v1171_v9 = vld [vmem:[%s2860_s6 + $0x190] sm:$0xff]  ;;  %v1140_v10 = vld [vmem:[%s2860_s6 + $0x98] sm:$0xff]  ;;  %v719_v12 = vpop.permute.xlu2 %718  ;;  %1284 = vmatpush.msrb.mxu1 %v1170_v48 }
 0x28c   : > { %1243 = vmatpush.msra.mxu3 %v1171_v9  ;;  %1263 = vmatpush.msrb.mxu0 %v1140_v10  ;;  %v950_v9 = vrot.slane %v949_v56, 1  ;;  %v957_v10 = vrot.slane %v956_v57, 1 }
 0x28d   : > { %v838_v30 = vadd.f32 %v2147_v24, %v2141_v18  ;;  %v845_v31 = vadd.f32 %v2150_v25, %v2144_v19  ;;  %v973_v33 = vmax.f32 %v2141_v18, %v2147_v24  ;;  %v980_v36 = vmax.f32 %v2144_v19, %v2150_v25  ;;  %1225 = vmatpush.msra.mxu2 %v1135_v50 }
 0x28e   : > { %1244 = vmatpush.msra.mxu3 %v1169_v42  ;;  %1264 = vmatpush.msrb.mxu0 %v1138_v47  ;;  %v823_v42 = vadd.f32 %v822_v6, %v821_v49  ;;  %v931_v49 = vmul.f32 %v2205_v58, %v830_v1  ;;  %v958_v50 = vmax.f32 %v956_v57, %v957_v10  ;;  %v1690_v6 = vld [vmem:[%s1780_s12 + $0x90] sm:$0xff]  ;;  %v1692_v10 = vld [vmem:[%s1780_s12 + $0x80] sm:$0xff] }
 0x28f   : > { %v839_v43 = vrot.slane %v838_v30, 4  ;;  %v846_v44 = vrot.slane %v845_v31, 4  ;;  %v974_v45 = vrot.slane %v973_v33, 4  ;;  %v981_v46 = vrot.slane %v980_v36, 4  ;;  %1285 = vmatpush.msrb.mxu1 %v1168_v53  ;;  %1226 = vmatpush.msra.mxu2 %v1133_v8  ;;  %v1159_v53 = vld [vmem:[%s2860_s6 + $0x130] sm:$0xff] }
 0x290   : > { %1245 = vmatpush.msra.mxu3 %v1167_v51  ;;  %1265 = vmatpush.msrb.mxu0 %v1136_v54  ;;  %v930_v8 = vmul.f32 %v2205_v58, %v823_v42 }
 0x291   : > { %v840_v4 = vadd.f32 %v839_v43, %v838_v30  ;;  %v847_v60 = vadd.f32 %v846_v44, %v845_v31  ;;  %v975_v13 = vmax.f32 %v973_v33, %v974_v45  ;;  %v982_v14 = vmax.f32 %v980_v36, %v981_v46  ;;  %1286 = vmatpush.msrb.mxu1 %v1166_v28  ;;  %v1129_v44 = vld [vmem:[%s2860_s6 + $0x40] sm:$0xff]  ;;  %v1691_v28 = vld [vmem:[%s1780_s12 + $0x98] sm:$0xff] }
 0x292   : > { %v725_v7 = vpop.permute.xlu1 %724  ;;  %v2233_v31 = vmul.f32 %v719_v12, %v1839_v22  ;;  %v2236_v33 = vmul.f32 %v719_v12, %v1842_v23  ;;  %1246 = vmatpush.msra.mxu3 %v1165_v15  ;;  %v965_v36 = vmax.f32 %v963_v41, %v964_v59  ;;  %1266 = vmatpush.msrb.mxu0 %v1134_v27  ;;  %v1132_v22 = vld [vmem:[%s2860_s6 + $0x58] sm:$0xff]  ;;  %v1127_v12 = vld [vmem:[%s2860_s6 + $0x30] sm:$0xff] }
 0x293   : > { %v2217_v17 = vmul.f32 %v725_v7, %v1833_v20  ;;  %v2220_v26 = vmul.f32 %v725_v7, %v1836_v21  ;;  %v1131_v20 = vld [vmem:[%s2860_s6 + $0x50] sm:$0xff]  ;;  %v837_v21 = vadd.f32 %v836_v2, %v835_v40  ;;  %v841_v30 = vrot.slane %v840_v4, 2  ;;  %v1164_v23 = vld [vmem:[%s2860_s6 + $0x158] sm:$0xff] }
 0x294   : > { %v848_v32 = vrot.slane %v847_v60, 2  ;;  %v976_v38 = vrot.slane %v975_v13, 2  ;;  %v983_v39 = vrot.slane %v982_v14, 2  ;;  %v816_v40 = vadd.f32 %v815_v16, %v814_v35  ;;  %1227 = vmatpush.msra.mxu2 %v1131_v20  ;;  %1247 = vmatpush.msra.mxu3 %v1163_v0  ;;  %v1161_v35 = vld [vmem:[%s2860_s6 + $0x140] sm:$0xff] }
 0x295   : > { %2880 = vst [vmem:[#allocation3_spill] sm:$0xff] %v2220_v26  ;;  %v852_v43 = vadd.f32 %v2217_v17, %v2233_v31  ;;  %v2251_v41 = vadd.f32 %v2220_v26, %v2236_v33  ;;  %v972_v45 = vmax.f32 %v970_v55, %v971_v29  ;;  %v951_v46 = vmax.f32 %v949_v56, %v950_v9  ;;  %v1130_v55 = vld [vmem:[%s2860_s6 + $0x48] sm:$0xff]  ;;  %v1160_v29 = vld [vmem:[%s2860_s6 + $0x138] sm:$0xff]  ;;  %v1125_v0 = vld [vmem:[%s2860_s6 + $0x20] sm:$0xff] }
 0x296   : > { %v987_v47 = vmax.f32 %v2233_v31, %v2217_v17  ;;  %v994_v48 = vmax.f32 %v2236_v33, %v2220_v26  ;;  %v842_v51 = vadd.f32 %v841_v30, %v840_v4  ;;  %1267 = vmatpush.msrb.mxu0 %v1132_v22  ;;  %1287 = vmatpush.msrb.mxu1 %v1164_v23  ;;  %v1162_v56 = vld [vmem:[%s2860_s6 + $0x148] sm:$0xff]  ;;  %v732_v4 = vpop.permute.xlu0 %731 }
 0x297   : > { %v2271_v7 = vmul.f32 %v2205_v58, %v837_v21  ;;  %v2273_v54 = vadd.f32 %v848_v32, %v847_v60  ;;  %v977_v2 = vmax.f32 %v975_v13, %v976_v38  ;;  %v984_v57 = vmax.f32 %v982_v14, %v983_v39  ;;  %1228 = vmatpush.msra.mxu2 %v1129_v44  ;;  %v1128_v14 = vld [vmem:[%s2860_s6 + $0x38] sm:$0xff]  ;;  %v1693_v21 = vld [vmem:[%s1780_s12 + $0x88] sm:$0xff]  ;;  %v1157_v32 = vld [vmem:[%s2860_s6 + $0x120] sm:$0xff] }
 0x298   : > { %v929_v59 = vmul.f32 %v2205_v58, %v816_v40  ;;  %v853_v60 = vrot.slane %v852_v43, 4  ;;  %v860_v13 = vrot.slane %v2251_v41, 4  ;;  %1248 = vmatpush.msra.mxu3 %v1161_v35  ;;  %v988_v15 = vrot.slane %v987_v47, 4  ;;  %1268 = vmatpush.msrb.mxu0 %v1130_v55  ;;  %v1126_v40 = vld [vmem:[%s2860_s6 + $0x28] sm:$0xff] }
 0x299   : > { %v995_v16 = vrot.slane %v994_v48, 4  ;;  %1288 = vmatpush.msrb.mxu1 %v1162_v56  ;;  %v843_v9 = vrot.slane %v842_v51, 1  ;;  %v2297_v20 = vmul.f32 %v1692_v10, %v732_v4  ;;  %v2300_v30 = vmul.f32 %v1693_v21, %v732_v4  ;;  %1229 = vmatpush.msra.mxu2 %v1127_v12  ;;  %v1123_v56 = vld [vmem:[%s2860_s6 + $0x10] sm:$0xff]  ;;  %v1694_v12 = vld [vmem:[%s1780_s12 + $0xa0] sm:$0xff] }
 0x29a   : > { %1249 = vmatpush.msra.mxu3 %v1159_v53  ;;  %v2309_v38 = vsel %vm530_vm2, %v965_v36, %v951_v46  ;;  %v850_v39 = vrot.slane %v2273_v54, 1  ;;  %v978_v22 = vrot.slane %v977_v2, 1  ;;  %v985_v23 = vrot.slane %v984_v57, 1  ;;  %1269 = vmatpush.msrb.mxu0 %v1128_v14  ;;  %v1158_v46 = vld [vmem:[%s2860_s6 + $0x128] sm:$0xff]  ;;  %v1155_v4 = vld [vmem:[%s2860_s6 + $0x110] sm:$0xff] }
 0x29b   : > { %v738_v52 = vpop.permute.xlu2 %737  ;;  %2883 = vst [vmem:[#allocation6_spill] sm:$0xff] %v2297_v20  ;;  %v2316_v42 = vsel %vm530_vm2, %v972_v45, %v958_v50  ;;  %v2318_v44 = vadd.f32 %v853_v60, %v852_v43  ;;  %1289 = vmatpush.msrb.mxu1 %v1160_v29  ;;  %v2331_v45 = vadd.f32 %v860_v13, %v2251_v41  ;;  %v1695_v41 = vld [vmem:[%s1780_s12 + $0xa8] sm:$0xff]  ;;  %v1156_v60 = vld [vmem:[%s2860_s6 + $0x118] sm:$0xff]  ;;  %v1696_v10 = vld [vmem:[%s1780_s12 + $0xb0] sm:$0xff] }
 0x29c   : > { %v2288_v27 = vmul.f32 %v1690_v6, %v738_v52  ;;  %v2291_v1 = vmul.f32 %v1691_v28, %v738_v52  ;;  %2884 = vst [vmem:[#allocation7_spill] sm:$0xff] %v2300_v30  ;;  %v2328_v52 = vsel %vm530_vm2, %v931_v49, %v929_v59  ;;  %v2333_v43 = vmax.f32 %v987_v47, %v988_v15  ;;  %v1124_v59 = vld [vmem:[%s2860_s6 + $0x18] sm:$0xff]  ;;  %v1121_v6 = vld [vmem:[%s2860_s6] sm:$0xff] }
 0x29d   : > { %v2335_v50 = vmax.f32 %v994_v48, %v995_v16  ;;  %1230 = vmatpush.msra.mxu2 %v1125_v0  ;;  %1250 = vmatpush.msra.mxu3 %v1157_v32  ;;  %v844_v49 = vadd.f32 %v843_v9, %v842_v51  ;;  %v2357_v51 = vsel %vm530_vm2, %v2271_v7, %v930_v8  ;;  %v1697_v7 = vld [vmem:[%s1780_s12 + $0xb8] sm:$0xff] }
 0x29e   : > { %2881 = vst [vmem:[#allocation4_spill] sm:$0xff] %v2288_v27  ;;  %v866_v35 = vadd.f32 %v2288_v27, %v2297_v20  ;;  %v873_v36 = vadd.f32 %v2291_v1, %v2300_v30  ;;  %1270 = vmatpush.msrb.mxu0 %v1126_v40  ;;  %v851_v13 = vadd.f32 %v850_v39, %v2273_v54  ;;  %v764_v28 = vpop.permute.xlu0 %763  ;;  %v1153_v54 = vld [vmem:[%s2860_s6 + $0x100] sm:$0xff]  ;;  %v990_v0 = vrot.slane %v2333_v43, 2  ;;  %v1122_v39 = vld [vmem:[%s2860_s6 + $0x8] sm:$0xff] }
 0x29f   : > { %2882 = vst [vmem:[#allocation5_spill] sm:$0xff] %v2291_v1  ;;  %v979_v14 = vmax.f32 %v977_v2, %v978_v22  ;;  %v2360_v15 = vmax.f32 %v984_v57, %v985_v23  ;;  %v1001_v16 = vmax.f32 %v2297_v20, %v2288_v27  ;;  %1290 = vmatpush.msrb.mxu1 %v1158_v46  ;;  %v855_v2 = vrot.slane %v2318_v44, 2  ;;  %v1154_v22 = vld [vmem:[%s2860_s6 + $0x108] sm:$0xff] }
 0x2a0   : > { %v867_v29 = vrot.slane %v866_v35, 4  ;;  %v874_v9 = vrot.slane %v873_v36, 4  ;;  %1231 = vmatpush.msra.mxu2 %v1123_v56  ;;  %1251 = vmatpush.msra.mxu3 %v1155_v4  ;;  %v862_v57 = vrot.slane %v2331_v45, 2  ;;  %v997_v32 = vrot.slane %v2335_v50, 2  ;;  %v1087_v56 = vld [vmem:[%s2859_s5 + $0xf0] sm:$0xff] }
 0x2a1   : > { %1271 = vmatpush.msrb.mxu0 %v1124_v59  ;;  %1291 = vmatpush.msrb.mxu1 %v1156_v60  ;;  %v2387_v23 = vmul.f32 %v2205_v58, %v844_v49  ;;  %v1008_v40 = vmax.f32 %v2300_v30, %v2291_v1  ;;  %v1119_v4 = vld [vmem:[%s2859_s5 + $0x1f0] sm:$0xff]  ;;  %v2402_v49 = vmul.f32 %v2205_v58, %v851_v13  ;;  %v1088_v60 = vld [vmem:[%s2859_s5 + $0xf8] sm:$0xff]  ;;  %v1113_v30 = vld [vmem:[%s2859_s5 + $0x1c0] sm:$0xff] }
 0x2a2   : > { %v745_v55 = vpop.permute.xlu1 %744  ;;  %1232 = vmatpush.msra.mxu2 %v1121_v6  ;;  %1252 = vmatpush.msra.mxu3 %v1153_v54  ;;  %v868_v6 = vadd.f32 %v867_v29, %v866_v35  ;;  %v856_v1 = vadd.f32 %v855_v2, %v2318_v44  ;;  %v2419_v54 = vadd.f32 %v862_v57, %v2331_v45  ;;  %v1085_v29 = vld [vmem:[%s2859_s5 + $0xe0] sm:$0xff] }
 0x2a3   : > { %v2344_v53 = vmul.f32 %v1694_v12, %v745_v55  ;;  %v2347_v47 = vmul.f32 %v1695_v41, %v745_v55  ;;  %v751_v48 = vpop.permute.xlu2 %750  ;;  %v1698_v12 = vld [vmem:[%s1780_s12 + $0xd0] sm:$0xff]  ;;  %1272 = vmatpush.msrb.mxu0 %v1122_v39  ;;  %1292 = vmatpush.msrb.mxu1 %v1154_v22  ;;  %v1117_v44 = vld [vmem:[%s2859_s5 + $0x1e0] sm:$0xff]  ;;  %v991_v45 = vmax.f32 %v2333_v43, %v990_v0  ;;  %v1009_v2 = vrot.slane %v1008_v40, 4  ;;  %v1118_v43 = vld [vmem:[%s2859_s5 + $0x1e8] sm:$0xff] }
 0x2a4   : > { %v2368_v21 = vmul.f32 %v1696_v10, %v751_v48  ;;  %v2371_v8 = vmul.f32 %v1697_v7, %v751_v48  ;;  %v2405_v41 = vmul.f32 %v1698_v12, %v764_v28  ;;  %v1002_v48 = vrot.slane %v1001_v16, 4  ;;  %v1120_v12 = vld [vmem:[%s2859_s5 + $0x1f8] sm:$0xff]  ;;  %1329 = vmatpush.msrb.mxu2 %v1087_v56  ;;  %1349 = vmatpush.msrb.mxu3 %v1119_v4  ;;  %v1700_v22 = vld [vmem:[%s1780_s12 + $0xc0] sm:$0xff]  ;;  %v1701_v4 = vld [vmem:[%s1780_s12 + $0xc8] sm:$0xff] }
 0x2a5   : > { %2885 = vst [vmem:[#allocation8_spill] sm:$0xff] %v2344_v53  ;;  %v875_v10 = vadd.f32 %v874_v9, %v873_v36  ;;  %v998_v9 = vmax.f32 %v2335_v50, %v997_v32  ;;  %1369 = vmatpush.msra.mxu0 %v1088_v60  ;;  %1389 = vmatpush.msra.mxu1 %v1120_v12  ;;  %v869_v50 = vrot.slane %v868_v6, 2 }
 0x2a6   : > { %2886 = vst [vmem:[#allocation9_spill] sm:$0xff] %v2347_v47  ;;  %v880_v46 = vadd.f32 %v2368_v21, %v2344_v53  ;;  %v887_v55 = vadd.f32 %v2371_v8, %v2347_v47  ;;  %v1015_v59 = vmax.f32 %v2344_v53, %v2368_v21  ;;  %v1022_v13 = vmax.f32 %v2347_v47, %v2371_v8 }
 0x2a7   : > { %2887 = vst [vmem:[#allocation10_spill] sm:$0xff] %v2368_v21  ;;  %v1699_v21 = vld [vmem:[%s1780_s12 + $0xd8] sm:$0xff]  ;;  %v1003_v57 = vmax.f32 %v1001_v16, %v1002_v48  ;;  %v876_v0 = vrot.slane %v875_v10, 2  ;;  %1330 = vmatpush.msrb.mxu2 %v1085_v29  ;;  %1350 = vmatpush.msrb.mxu3 %v1117_v44  ;;  %v857_v16 = vrot.slane %v856_v1, 1  ;;  %v864_v29 = vrot.slane %v2419_v54, 1 }
 0x2a8   : > { %2888 = vst [vmem:[#allocation11_spill] sm:$0xff] %v2371_v8  ;;  %v881_v7 = vrot.slane %v880_v46, 4  ;;  %v2422_v53 = vmul.f32 %v1699_v21, %v764_v28  ;;  %v888_v35 = vrot.slane %v887_v55, 4  ;;  %v1086_v28 = vld [vmem:[%s2859_s5 + $0xe8] sm:$0xff]  ;;  %v2437_v21 = vsel %vm532_vm3, %v979_v14, %v2309_v38  ;;  %v1083_v38 = vld [vmem:[%s2859_s5 + $0xd0] sm:$0xff]  ;;  %1390 = vmatpush.msra.mxu1 %v1118_v43 }
 0x2a9   : > { %2889 = vst [vmem:[#allocation12_spill] sm:$0xff] %v2405_v41  ;;  %v1016_v39 = vrot.slane %v1015_v59, 4  ;;  %v1023_v60 = vrot.slane %v1022_v13, 4  ;;  %v1115_v14 = vld [vmem:[%s2859_s5 + $0x1d0] sm:$0xff]  ;;  %1370 = vmatpush.msra.mxu0 %v1086_v28  ;;  %v992_v44 = vrot.slane %v991_v45, 1  ;;  %1331 = vmatpush.msrb.mxu2 %v1083_v38  ;;  %v2482_v43 = vadd.f32 %v876_v0, %v875_v10  ;;  %v1114_v38 = vld [vmem:[%s2859_s5 + $0x1c8] sm:$0xff] }
 0x2aa   : > { %2890 = vst [vmem:[#allocation13_spill] sm:$0xff] %v2422_v53  ;;  %v758_v36 = vpop.permute.xlu1 %757  ;;  %v882_v32 = vadd.f32 %v881_v7, %v880_v46  ;;  %v889_v48 = vadd.f32 %v888_v35, %v887_v55  ;;  %v1084_v46 = vld [vmem:[%s2859_s5 + $0xd8] sm:$0xff]  ;;  %v1010_v55 = vmax.f32 %v1008_v40, %v1009_v2  ;;  %v1081_v35 = vld [vmem:[%s2859_s5 + $0xc0] sm:$0xff]  ;;  %1351 = vmatpush.msrb.mxu3 %v1115_v14  ;;  %v1082_v40 = vld [vmem:[%s2859_s5 + $0xc8] sm:$0xff] }
 0x2ab   : > { %v2440_v56 = vmul.f32 %v1700_v22, %v758_v36  ;;  %v2443_v8 = vmul.f32 %v1701_v4, %v758_v36  ;;  %v1116_v7 = vld [vmem:[%s2859_s5 + $0x1d8] sm:$0xff]  ;;  %v999_v22 = vrot.slane %v998_v9, 1  ;;  %v1004_v4 = vrot.slane %v1003_v57, 2  ;;  %1371 = vmatpush.msra.mxu0 %v1084_v46  ;;  %v1079_v14 = vld [vmem:[%s2859_s5 + $0xb0] sm:$0xff]  ;;  %1332 = vmatpush.msrb.mxu2 %v1081_v35 }
 0x2ac   : > { %v2468_v28 = vmax.f32 %v1015_v59, %v1016_v39  ;;  %v2480_v2 = vadd.f32 %v869_v50, %v868_v6  ;;  %v883_v59 = vrot.slane %v882_v32, 2  ;;  %v2484_v39 = vmax.f32 %v1022_v13, %v1023_v60  ;;  %1391 = vmatpush.msra.mxu1 %v1116_v7  ;;  %v1111_v13 = vld [vmem:[%s2859_s5 + $0x1b0] sm:$0xff]  ;;  %v1080_v50 = vld [vmem:[%s2859_s5 + $0xb8] sm:$0xff]  ;;  %1352 = vmatpush.msrb.mxu3 %v1113_v30  ;;  %v1077_v7 = vld [vmem:[%s2859_s5 + $0xa0] sm:$0xff] }
 0x2ad   : > { %2891 = vst [vmem:[#allocation14_spill] sm:$0xff] %v2440_v56  ;;  %v1029_v12 = vmax.f32 %v2440_v56, %v2405_v41  ;;  %v1036_v36 = vmax.f32 %v2443_v8, %v2422_v53  ;;  %v2472_v47 = vadd.f32 %v2405_v41, %v2440_v56  ;;  %v858_v41 = vadd.f32 %v857_v16, %v856_v1  ;;  %v1112_v16 = vld [vmem:[%s2859_s5 + $0x1b8] sm:$0xff]  ;;  %v1109_v30 = vld [vmem:[%s2859_s5 + $0x1a0] sm:$0xff] }
 0x2ae   : > { %2892 = vst [vmem:[#allocation15_spill] sm:$0xff] %v2443_v8  ;;  %v890_v56 = vrot.slane %v889_v48, 2  ;;  %v901_v6 = vadd.f32 %v2422_v53, %v2443_v8  ;;  %v865_v0 = vadd.f32 %v864_v29, %v2419_v54  ;;  %v993_v60 = vmax.f32 %v991_v45, %v992_v44  ;;  %1372 = vmatpush.msra.mxu0 %v1082_v40 }
 0x2af   : > { %v1030_v27 = vrot.slane %v1029_v12, 4  ;;  %v1037_v10 = vrot.slane %v1036_v36, 4  ;;  %v2501_v46 = vmax.f32 %v998_v9, %v999_v22  ;;  %v1011_v1 = vrot.slane %v1010_v55, 2  ;;  %1392 = vmatpush.msra.mxu1 %v1114_v38  ;;  %1333 = vmatpush.msrb.mxu2 %v1079_v14  ;;  %v1078_v9 = vld [vmem:[%s2859_s5 + $0xa8] sm:$0xff]  ;;  %v1076_v14 = vld [vmem:[%s2859_s5 + $0x98] sm:$0xff] }
 0x2b0   : > { %v2509_v35 = vmax.f32 %v1003_v57, %v1004_v4  ;;  %v1018_v53 = vrot.slane %v2468_v28, 2  ;;  %v895_v54 = vrot.slane %v2472_v47, 4  ;;  %v871_v29 = vrot.slane %v2480_v2, 1  ;;  %1353 = vmatpush.msrb.mxu3 %v1111_v13  ;;  %1373 = vmatpush.msra.mxu0 %v1080_v50 }
 0x2b1   : > { %v2513_v45 = vmax.f32 %v1029_v12, %v1030_v27  ;;  %v878_v57 = vrot.slane %v2482_v43, 1  ;;  %v2523_v44 = vadd.f32 %v883_v59, %v882_v32  ;;  %v1025_v22 = vrot.slane %v2484_v39, 2  ;;  %v1110_v27 = vld [vmem:[%s2859_s5 + $0x1a8] sm:$0xff]  ;;  %v1075_v12 = vld [vmem:[%s2859_s5 + $0x90] sm:$0xff]  ;;  %1393 = vmatpush.msra.mxu1 %v1112_v16  ;;  %1334 = vmatpush.msrb.mxu2 %v1077_v7  ;;  %v1105_v16 = vld [vmem:[%s2859_s5 + $0x180] sm:$0xff] }
 0x2b2   : > { %v2533_v4 = vmul.f32 %v2205_v58, %v858_v41  ;;  %v2535_v40 = vadd.f32 %v890_v56, %v889_v48  ;;  %v902_v38 = vrot.slane %v901_v6, 4  ;;  %v2537_v32 = vmax.f32 %v1036_v36, %v1037_v10  ;;  %v1107_v59 = vld [vmem:[%s2859_s5 + $0x190] sm:$0xff]  ;;  %1354 = vmatpush.msrb.mxu3 %v1109_v30  ;;  %1374 = vmatpush.msra.mxu0 %v1078_v9  ;;  %v1108_v48 = vld [vmem:[%s2859_s5 + $0x198] sm:$0xff]  ;;  %v1073_v36 = vld [vmem:[%s2859_s5 + $0x80] sm:$0xff] }
 0x2b3   : > { %v2546_v13 = vmul.f32 %v2205_v58, %v865_v0  ;;  %v2548_v41 = vmax.f32 %v1010_v55, %v1011_v1  ;;  %v771_v56 = vpop.permute.xlu2 %770  ;;  %v2558_v10 = vsel %vm534_vm4, %v993_v60, %v2437_v21  ;;  %v1006_v50 = vrot.slane %v2509_v35, 1  ;;  %1394 = vmatpush.msra.mxu1 %v1110_v27  ;;  %1335 = vmatpush.msrb.mxu2 %v1075_v12  ;;  %v1074_v21 = vld [vmem:[%s2859_s5 + $0x88] sm:$0xff] }
 0x2b4   : > { %v2562_v55 = vmax.f32 %v2468_v28, %v1018_v53  ;;  %v2565_v0 = vadd.f32 %v895_v54, %v2472_v47  ;;  %v1032_v1 = vrot.slane %v2513_v45, 2  ;;  %v2575_v60 = vadd.f32 %v871_v29, %v2480_v2  ;;  %1355 = vmatpush.msrb.mxu3 %v1107_v59  ;;  %1375 = vmatpush.msra.mxu0 %v1076_v14  ;;  %v1106_v7 = vld [vmem:[%s2859_s5 + $0x188] sm:$0xff]  ;;  %v1071_v2 = vld [vmem:[%s2859_s5 + $0x70] sm:$0xff] }
 0x2b5   : > { %v2578_v53 = vadd.f32 %v878_v57, %v2482_v43  ;;  %v885_v47 = vrot.slane %v2523_v44, 1  ;;  %v2582_v28 = vmax.f32 %v2484_v39, %v1025_v22  ;;  %v892_v43 = vrot.slane %v2535_v40, 1  ;;  %v1702_v39 = vld [vmem:[%s1780_s12 + $0xe0] sm:$0xff]  ;;  %1395 = vmatpush.msra.mxu1 %v1108_v48  ;;  %1336 = vmatpush.msrb.mxu2 %v1073_v36  ;;  %v1103_v57 = vld [vmem:[%s2859_s5 + $0x170] sm:$0xff]  ;;  %v1703_v27 = vld [vmem:[%s1780_s12 + $0xe8] sm:$0xff] }
 0x2b6   : > { %v2591_v54 = vadd.f32 %v902_v38, %v901_v6  ;;  %v1039_v30 = vrot.slane %v2537_v32, 2  ;;  %v2595_v9 = vmul.f32 %v1702_v39, %v771_v56  ;;  %v1013_v22 = vrot.slane %v2548_v41, 1  ;;  %v1704_v59 = vld [vmem:[%s1780_s12 + $0xf0] sm:$0xff]  ;;  %v1705_v38 = vld [vmem:[%s1780_s12 + $0xf8] sm:$0xff]  ;;  %1356 = vmatpush.msrb.mxu3 %v1105_v16  ;;  %1376 = vmatpush.msra.mxu0 %v1074_v21  ;;  %v1101_v16 = vld [vmem:[%s2859_s5 + $0x160] sm:$0xff] }
 0x2b7   : > { %v2602_v12 = vmul.f32 %v1703_v27, %v771_v56  ;;  %v1072_v48 = vld [vmem:[%s2859_s5 + $0x78] sm:$0xff]  ;;  %v897_v39 = vrot.slane %v2565_v0, 2  ;;  %1396 = vmatpush.msra.mxu1 %v1106_v7  ;;  %1337 = vmatpush.msrb.mxu2 %v1071_v2  ;;  %v1069_v56 = vld [vmem:[%s2859_s5 + $0x60] sm:$0xff]  ;;  %v1007_v21 = vmax.f32 %v2509_v35, %v1006_v50  ;;  %v1033_v27 = vmax.f32 %v2513_v45, %v1032_v1  ;;  %v1070_v35 = vld [vmem:[%s2859_s5 + $0x68] sm:$0xff] }
 0x2b8   : > { %2893 = vst [vmem:[#allocation16_spill] sm:$0xff] %v2595_v9  ;;  %v1104_v36 = vld [vmem:[%s2859_s5 + $0x178] sm:$0xff]  ;;  %1357 = vmatpush.msrb.mxu3 %v1103_v57  ;;  %v1102_v45 = vld [vmem:[%s2859_s5 + $0x168] sm:$0xff]  ;;  %v2641_v50 = vadd.f32 %v885_v47, %v2523_v44  ;;  %v2644_v1 = vadd.f32 %v892_v43, %v2535_v40  ;;  %1377 = vmatpush.msra.mxu0 %v1072_v48  ;;  %v1067_v57 = vld [vmem:[%s2859_s5 + $0x50] sm:$0xff] }
 0x2b9   : > { %2894 = vst [vmem:[#allocation17_spill] sm:$0xff] %v2602_v12  ;;  %1397 = vmatpush.msra.mxu1 %v1104_v36  ;;  %1338 = vmatpush.msrb.mxu2 %v1069_v56  ;;  %v1099_v44 = vld [vmem:[%s2859_s5 + $0x150] sm:$0xff]  ;;  %v1068_v40 = vld [vmem:[%s2859_s5 + $0x58] sm:$0xff]  ;;  %v2658_v47 = vadd.f32 %v897_v39, %v2565_v0  ;;  %v1065_v43 = vld [vmem:[%s2859_s5 + $0x40] sm:$0xff]  ;;  %v1034_v48 = vrot.slane %v1033_v27, 1  ;;  %v1027_v36 = vrot.slane %v2582_v28, 1 }
 0x2ba   : > { %v777_v29 = vpop.permute.xlu1 %776  ;;  %1358 = vmatpush.msrb.mxu3 %v1101_v16  ;;  %1378 = vmatpush.msra.mxu0 %v1070_v35  ;;  %v1097_v39 = vld [vmem:[%s2859_s5 + $0x140] sm:$0xff]  ;;  %v1066_v35 = vld [vmem:[%s2859_s5 + $0x48] sm:$0xff] }
 0x2bb   : > { %v2605_v6 = vmul.f32 %v1704_v59, %v777_v29  ;;  %v2608_v14 = vmul.f32 %v1705_v38, %v777_v29  ;;  %v1020_v29 = vrot.slane %v2562_v55, 1  ;;  %1398 = vmatpush.msra.mxu1 %v1102_v45  ;;  %1339 = vmatpush.msrb.mxu2 %v1067_v57 }
 0x2bc   : > { %1359 = vmatpush.msrb.mxu3 %v1099_v44  ;;  %1379 = vmatpush.msra.mxu0 %v1068_v40 }
 0x2bd   : > { %2895 = vst [vmem:[#allocation18_spill] sm:$0xff] %v2605_v6  ;;  %v908_v59 = vadd.f32 %v2605_v6, %v2595_v9  ;;  %v915_v7 = vadd.f32 %v2608_v14, %v2602_v12  ;;  %v1043_v2 = vmax.f32 %v2595_v9, %v2605_v6  ;;  %v1050_v38 = vmax.f32 %v2602_v12, %v2608_v14 }
 0x2be   : > { %2896 = vst [vmem:[#allocation19_spill] sm:$0xff] %v2608_v14  ;;  %v904_v6 = vrot.slane %v2591_v54, 2  ;;  %v1040_v14 = vmax.f32 %v2537_v32, %v1039_v30  ;;  %v1100_v32 = vld [vmem:[%s2859_s5 + $0x158] sm:$0xff]  ;;  %v1021_v30 = vmax.f32 %v2562_v55, %v1020_v29  ;;  %v1098_v55 = vld [vmem:[%s2859_s5 + $0x148] sm:$0xff]  ;;  %1340 = vmatpush.msrb.mxu2 %v1065_v43  ;;  %1360 = vmatpush.msrb.mxu3 %v1097_v39 }
 0x2bf   : > { %v909_v12 = vrot.slane %v908_v59, 4  ;;  %v916_v9 = vrot.slane %v915_v7, 4  ;;  %v1044_v8 = vrot.slane %v1043_v2, 4  ;;  %v1051_v20 = vrot.slane %v1050_v38, 4  ;;  %1399 = vmatpush.msra.mxu1 %v1100_v32  ;;  %1380 = vmatpush.msra.mxu0 %v1066_v35 }
 0x2c0   : > { %v905_v45 = vadd.f32 %v904_v6, %v2591_v54  ;;  %v1063_v54 = vld [vmem:[%s2859_s5 + $0x30] sm:$0xff] }
 0x2c1   : > { %v910_v56 = vadd.f32 %v909_v12, %v908_v59  ;;  %v917_v16 = vadd.f32 %v916_v9, %v915_v7  ;;  %v1045_v26 = vmax.f32 %v1043_v2, %v1044_v8  ;;  %v1052_v0 = vmax.f32 %v1050_v38, %v1051_v20  ;;  %v1095_v6 = vld [vmem:[%s2859_s5 + $0x130] sm:$0xff]  ;;  %v1096_v38 = vld [vmem:[%s2859_s5 + $0x138] sm:$0xff]  ;;  %1400 = vmatpush.msra.mxu1 %v1098_v55 }
 0x2c2   : > { %v1204_v20 = vsel %vm536_vm5, %v1007_v21, %v2558_v10  ;;  %v1014_v8 = vmax.f32 %v2548_v41, %v1013_v22  ;;  %v1041_v9 = vrot.slane %v1040_v14, 1  ;;  %v899_v2 = vrot.slane %v2658_v47, 1  ;;  %v1064_v21 = vld [vmem:[%s2859_s5 + $0x38] sm:$0xff]  ;;  %1341 = vmatpush.msrb.mxu2 %v1063_v54  ;;  %1361 = vmatpush.msrb.mxu3 %v1095_v6 }
 0x2c3   : > { %v911_v12 = vrot.slane %v910_v56, 2  ;;  %v918_v29 = vrot.slane %v917_v16, 2  ;;  %v1046_v59 = vrot.slane %v1045_v26, 2  ;;  %v1053_v7 = vrot.slane %v1052_v0, 2  ;;  %1381 = vmatpush.msra.mxu0 %v1064_v21  ;;  %1401 = vmatpush.msra.mxu1 %v1096_v38  ;;  %v1060_v55 = vld [vmem:[%s2859_s5 + $0x18] sm:$0xff] }
 0x2c4   : > { %v1035_v41 = vmax.f32 %v1033_v27, %v1034_v48  ;;  %v1028_v10 = vmax.f32 %v2582_v28, %v1027_v36  ;;  %v1209_v22 = vsel %vm532_vm3, %v2360_v15, %v2316_v42  ;;  %v1061_v28 = vld [vmem:[%s2859_s5 + $0x20] sm:$0xff]  ;;  %v906_v15 = vrot.slane %v905_v45, 1  ;;  %v1094_v36 = vld [vmem:[%s2859_s5 + $0x128] sm:$0xff] }
 0x2c5   : > { %v912_v57 = vadd.f32 %v911_v12, %v910_v56  ;;  %v919_v44 = vadd.f32 %v918_v29, %v917_v16  ;;  %v1047_v40 = vmax.f32 %v1045_v26, %v1046_v59  ;;  %v1054_v32 = vmax.f32 %v1052_v0, %v1053_v7  ;;  %v1093_v42 = vld [vmem:[%s2859_s5 + $0x120] sm:$0xff]  ;;  %v1062_v26 = vld [vmem:[%s2859_s5 + $0x28] sm:$0xff]  ;;  %1342 = vmatpush.msrb.mxu2 %v1061_v28 }
 0x2c6   : > { %v1205_v27 = vsel %vm538_vm6, %v1021_v30, %v1204_v20  ;;  %v1042_v43 = vmax.f32 %v1040_v14, %v1041_v9  ;;  %v1210_v48 = vsel %vm534_vm4, %v2501_v46, %v1209_v22  ;;  %v1059_v14 = vld [vmem:[%s2859_s5 + $0x10] sm:$0xff]  ;;  %1362 = vmatpush.msrb.mxu3 %v1093_v42  ;;  %v1092_v20 = vld [vmem:[%s2859_s5 + $0x118] sm:$0xff]  ;;  %v900_v9 = vadd.f32 %v899_v2, %v2658_v47  ;;  %v1057_v47 = vld [vmem:[%s2859_s5] sm:$0xff] }
 0x2c7   : > { %v1048_v56 = vrot.slane %v1047_v40, 1  ;;  %v1055_v16 = vrot.slane %v1054_v32, 1  ;;  %v1091_v46 = vld [vmem:[%s2859_s5 + $0x110] sm:$0xff]  ;;  %v913_v30 = vrot.slane %v912_v57, 1  ;;  %v920_v0 = vrot.slane %v919_v44, 1  ;;  %1382 = vmatpush.msra.mxu0 %v1062_v26  ;;  %1402 = vmatpush.msra.mxu1 %v1094_v36  ;;  %v1089_v2 = vld [vmem:[%s2859_s5 + $0x100] sm:$0xff] }
 0x2c8   : > { %v1206_v39 = vsel %vm540_vm7, %v1035_v41, %v1205_v27  ;;  %v1211_v35 = vsel %vm536_vm5, %v1014_v8, %v1210_v48  ;;  %1343 = vmatpush.msrb.mxu2 %v1059_v14  ;;  %1363 = vmatpush.msrb.mxu3 %v1091_v46  ;;  %v907_v54 = vadd.f32 %v906_v15, %v905_v45  ;;  %v1058_v45 = vld [vmem:[%s2859_s5 + $0x8] sm:$0xff]  ;;  %v1410_v46 = vstv %s1409_s21 }
 0x2c9   : > { %v1049_v12 = vmax.f32 %v1047_v40, %v1048_v56  ;;  %v1056_v29 = vmax.f32 %v1054_v32, %v1055_v16  ;;  %v1212_v59 = vsel %vm538_vm6, %v1028_v10, %v1211_v35  ;;  %v914_v7 = vadd.f32 %v913_v30, %v912_v57  ;;  %1383 = vmatpush.msra.mxu0 %v1060_v55  ;;  %v1090_v22 = vld [vmem:[%s2859_s5 + $0x108] sm:$0xff] }
 0x2ca   : > { %v1213_v8 = vsel %vm540_vm7, %v1042_v43, %v1212_v59  ;;  %1403 = vmatpush.msra.mxu1 %v1092_v20  ;;  %v921_v10 = vadd.f32 %v920_v0, %v919_v44  ;;  %v937_v21 = vmul.f32 %v2205_v58, %v2575_v60  ;;  %v939_v38 = vmul.f32 %v2205_v58, %v2641_v50 }
 0x2cb   : > { %v1207_v6 = vsel %vm542_vm8, %v1049_v12, %v1206_v39  ;;  %v1214_v41 = vsel %vm542_vm8, %v1056_v29, %v1213_v8  ;;  %v938_v57 = vmul.f32 %v2205_v58, %v2578_v53  ;;  %v941_v44 = vmul.f32 %v2205_v58, %v900_v9  ;;  %1344 = vmatpush.msrb.mxu2 %v1057_v47 }
 0x2cc   : > { %1233 = vmatmul.f32.vlgmr.msra.gmra.mxu2 %v1207_v6  ;;  %1253 = vmatmul.f32.vlgmr.msra.gmra.mxu3 %v1214_v41  ;;  %v1314_v40 = vsel %vm532_vm3, %v2387_v23, %v2328_v52  ;;  %v940_v32 = vmul.f32 %v2205_v58, %v2644_v1  ;;  %v942_v50 = vmul.f32 %v2205_v58, %v907_v54 }
 0x2cd   : > { %1273 = vmatmul.f32.vlgmr.msrb.gmra.mxu0 %v1207_v6  ;;  %1293 = vmatmul.f32.vlgmr.msrb.gmra.mxu1 %v1214_v41  ;;  %v1315_v60 = vsel %vm534_vm4, %v2533_v4, %v1314_v40  ;;  %v1321_v53 = vsel %vm532_vm3, %v2402_v49, %v2357_v51  ;;  %v943_v28 = vmul.f32 %v2205_v58, %v914_v7 }
 0x2ce   : > { %1364 = vmatpush.msrb.mxu3 %v1089_v2  ;;  %1384 = vmatpush.msra.mxu0 %v1058_v45  ;;  %v944_v52 = vmul.f32 %v2205_v58, %v921_v10  ;;  %v1322_v23 = vsel %vm534_vm4, %v2546_v13, %v1321_v53  ;;  %v1316_v1 = vsel %vm536_vm5, %v937_v21, %v1315_v60 }
 0x2cf   : > { %1404 = vmatpush.msra.mxu1 %v1090_v22  ;;  %v1323_v42 = vsel %vm536_vm5, %v938_v57, %v1322_v23  ;;  %v1317_v4 = vsel %vm538_vm6, %v939_v38, %v1316_v1 }
 0x2d0   : > { %v1324_v15 = vsel %vm538_vm6, %v940_v32, %v1323_v42  ;;  %v1318_v27 = vsel %vm540_vm7, %v941_v44, %v1317_v4 }
 0x2d1   : > { %v1325_v51 = vsel %vm540_vm7, %v942_v50, %v1324_v15  ;;  %v1319_v49 = vsel %vm542_vm8, %v943_v28, %v1318_v27 }
 0x2d2   : > { %v1326_v43 = vsel %vm542_vm8, %v944_v52, %v1325_v51 }
 0x2d4   : > { %1345 = vmatmul.f32.vlgmr.msrb.gmra.mxu2 %v1319_v49  ;;  %1365 = vmatmul.f32.vlgmr.msrb.gmra.mxu3 %v1326_v43 }
 0x2d5   : > { %1385 = vmatmul.f32.vlgmr.msra.gmra.mxu0 %v1319_v49  ;;  %1405 = vmatmul.f32.vlgmr.msra.gmra.mxu1 %v1326_v43 }
 0x34a   : > { %v1274_v58 = vpop.f32.mrf.mxu0  ;;  %v1294_v13 = vpop.f32.mrf.mxu1 }
 0x34b   : > { %v1295_v48 = vadd.f32 %v1294_v13, %v1274_v58 }
 0x34f   : > { %v1234_v26 = vpop.f32.mrf.mxu2  ;;  %v1254_v16 = vpop.f32.mrf.mxu3 }
 0x350   : > { %v1255_v35 = vadd.f32 %v1254_v16, %v1234_v26 }
 0x352   : > { %v1386_v36 = vpop.f32.mrf.mxu0  ;;  %v1406_v14 = vpop.f32.mrf.mxu1 }
 0x353   : > { %v1387_v56 = vadd.f32 %v1386_v36, %v1295_v48 }
 0x355   : > { %v1407_v30 = vadd.f32 %v1406_v14, %v1387_v56 }
 0x357   : > { %v1412_v0 = vadd.f32 %v1410_v46, %v1407_v30  ;;  %v1346_v20 = vpop.f32.mrf.mxu2  ;;  %v1366_v29 = vpop.f32.mrf.mxu3 }
 0x358   : > { %v1347_v12 = vadd.f32 %v1346_v20, %v1255_v35 }
 0x359   : > { %v1414_v39 = vand.u32 2147483647, %v1412_v0  ;;  %vm1422_vm12 = vcmp.ge.f32.partialorder %v1412_v0, 0.0 }
 0x35a   : > { %v1367_v59 = vadd.f32 %v1366_v29, %v1347_v12 }
 0x35b   : > { %v1416_v55 = vsub.f32 0.0, %v1414_v39 }
 0x35c   : > { %v1411_v8 = vadd.f32 %v1410_v46, %v1367_v59 }
 0x35d   : > { %v1419_v9 = vmul.f32 1.442695, %v1416_v55 }
 0x35e   : > { %v1413_v7 = vand.u32 2147483647, %v1411_v8 }
 0x35f   : > { %1682 = vpow2.f32 %v1419_v9 }
 0x360   : > { %v1415_v6 = vsub.f32 0.0, %v1413_v7 }
 0x362   : > { %v1417_v47 = vmul.f32 1.442695, %v1415_v6 }
 0x365   : > { %v1683_v54 = vpop.eup %1682 }
 0x366   : > { %v1424_v41 = vadd.f32 1.0, %v1683_v54 }
 0x368   : > { %1684 = vrcp.f32 %v1424_v41  ;;  %v1451_v57 = vand.u32 2147483648, %v1424_v41  ;;  %vm1445_vm1 = vweird.f32 %v1424_v41  ;;  %v1449_v40 = vand.u32 2147483647, %v1424_v41 }
 0x369   : > { %1686 = vpow2.f32 %v1417_v47 }
 0x36a   : > { %v1452_v50 = vor.u32 1.1754944e-38, %v1451_v57  ;;  %vm1450_vm9 = vcmp.eq.f32.partialorder %v1449_v40, 8.507059e+37  ;;  %v2898_v57 = vld [vmem:[#allocation6_spill] sm:$0xff] }
 0x36e   : > { %v1685_v2 = vpop.eup %1684 }
 0x36f   : > { %v1687_v10 = vpop.eup %1686  ;;  %v1441_v45 = vmul.f32 %v1685_v2, %v1424_v41  ;;  %vm1446_vm0 = vweird.f32 %v1685_v2 }
 0x370   : > { %v1423_v22 = vadd.f32 1.0, %v1687_v10  ;;  %vm1447_vm8 = vmor %vm1445_vm1, %vm1446_vm0  ;;  %vm1421_vm0 = vcmp.ge.f32.partialorder %v1411_v8, 0.0 }
 0x371   : > { %v1442_v21 = vsub.f32 1.0, %v1441_v45 }
 0x372   : > { %1688 = vrcp.f32 %v1423_v22  ;;  %v1436_v23 = vand.u32 2147483648, %v1423_v22  ;;  %v1434_v4 = vand.u32 2147483647, %v1423_v22  ;;  %vm1430_vm11 = vweird.f32 %v1423_v22 }
 0x373   : > { %v1443_v38 = vmul.f32 %v1685_v2, %v1442_v21 }
 0x374   : > { %v1437_v27 = vor.u32 1.1754944e-38, %v1436_v23  ;;  %vm1435_vm14 = vcmp.eq.f32.partialorder %v1434_v4, 8.507059e+37 }
 0x375   : > { %v1444_v44 = vadd.f32 %v1685_v2, %v1443_v38 }
 0x377   : > { %v1448_v32 = vsel %vm1447_vm8, %v1685_v2, %v1444_v44 }
 0x378   : > { %v1689_v60 = vpop.eup %1688  ;;  %v1453_v28 = vsel %vm1450_vm9, %v1452_v50, %v1448_v32  ;;  %v2899_v32 = vld [vmem:[#allocation7_spill] sm:$0xff]  ;;  %v2900_v50 = vld [vmem:[#allocation4_spill] sm:$0xff] }
 0x379   : > { %v1426_v53 = vmul.f32 %v1689_v60, %v1423_v22  ;;  %v1456_v1 = vmul.f32 %v1683_v54, %v1453_v28  ;;  %vm1431_vm10 = vweird.f32 %v1689_v60 }
 0x37a   : > { %vm1432_vm13 = vmor %vm1430_vm11, %vm1431_vm10 }
 0x37b   : > { %v1427_v52 = vsub.f32 1.0, %v1426_v53  ;;  %v1458_v51 = vsel %vm1422_vm12, %v1453_v28, %v1456_v1  ;;  %v2901_v53 = vld [vmem:[#allocation5_spill] sm:$0xff]  ;;  %v2902_v1 = vld [vmem:[#allocation8_spill] sm:$0xff] }
 0x37c   : > { %v1461_v13 = vrot.slane %v1458_v51, 7  ;;  %v2904_v51 = vld [vmem:[#allocation10_spill] sm:$0xff] }
 0x37d   : > { %v1428_v42 = vmul.f32 %v1689_v60, %v1427_v52 }
 0x37f   : > { %v1429_v15 = vadd.f32 %v1689_v60, %v1428_v42 }
 0x381   : > { %v1433_v49 = vsel %vm1432_vm13, %v1689_v60, %v1429_v15  ;;  %v2903_v15 = vld [vmem:[#allocation9_spill] sm:$0xff] }
 0x382   : > { %v1438_v43 = vsel %vm1435_vm14, %v1437_v27, %v1433_v49 }
 0x383   : > { %v1455_v58 = vmul.f32 %v1687_v10, %v1438_v43 }
 0x385   : > { %v1457_v48 = vsel %vm1421_vm0, %v1438_v43, %v1455_v58  ;;  %v2905_v43 = vld [vmem:[#allocation11_spill] sm:$0xff] }
 0x386   : > { %v1463_v26 = vsel %vm1462_vm15, %v1457_v48, %v1461_v13  ;;  %v1464_v36 = vsel %vm530_vm2, %v1457_v48, %v1461_v13  ;;  %v1466_v16 = vsel %vm532_vm3, %v1457_v48, %v1461_v13  ;;  %v1468_v39 = vsel %vm534_vm4, %v1457_v48, %v1461_v13 }
 0x387   : > { %v1465_v56 = vrot.slane %v1464_v36, 1  ;;  %v1479_v14 = vperm.slane %v1463_v26, 0  ;;  %v1480_v46 = vperm.slane %v1463_v26, 1  ;;  %v1467_v30 = vrot.slane %v1466_v16, 2 }
 0x388   : > { %v1469_v29 = vrot.slane %v1468_v39, 3  ;;  %v1470_v7 = vsel %vm536_vm5, %v1457_v48, %v1461_v13  ;;  %v1472_v41 = vsel %vm538_vm6, %v1457_v48, %v1461_v13  ;;  %v1474_v45 = vsel %vm540_vm7, %v1457_v48, %v1461_v13  ;;  %v2910_v39 = vld [vmem:[#allocation16_spill] sm:$0xff] }
 0x389   : > { %v1481_v0 = vperm.slane %v1465_v56, 0  ;;  %v1482_v35 = vperm.slane %v1465_v56, 1  ;;  %v1511_v55 = vmul.f32 %v1479_v14, %v2040_v3  ;;  %v1512_v20 = vmul.f32 %v1480_v46, %v2057_v5  ;;  %v2907_v56 = vld [vmem:[#allocation15_spill] sm:$0xff] }
 0x38a   : > { %v1513_v9 = vmul.f32 %v1479_v14, %v2034_v37  ;;  %v1514_v12 = vmul.f32 %v1480_v46, %v2045_v11  ;;  %v1483_v59 = vperm.slane %v1467_v30, 0  ;;  %v1484_v54 = vperm.slane %v1467_v30, 1  ;;  %v2908_v14 = vld [vmem:[#allocation12_spill] sm:$0xff]  ;;  %v2909_v30 = vld [vmem:[#allocation13_spill] sm:$0xff] }
 0x38b   : > { %v1515_v8 = vmul.f32 %v1481_v0, %v2028_v62  ;;  %1543 = vst [vmem:[%s2781_s24] sm:$0xff] %v1511_v55  ;;  %v1516_v6 = vmul.f32 %v1482_v35, %v2031_v34  ;;  %v1517_v3 = vmul.f32 %v1481_v0, %v2025_v61  ;;  %v1518_v37 = vmul.f32 %v1482_v35, %v2037_v63  ;;  %v2911_v55 = vld [vmem:[#allocation17_spill] sm:$0xff] }
 0x38c   : > { %1544 = vst [vmem:[%s2781_s24 + $0x8] sm:$0xff] %v1512_v20  ;;  %v1471_v11 = vrot.slane %v1470_v7, 4  ;;  %v1485_v5 = vperm.slane %v1469_v29, 0  ;;  %v1519_v62 = vmul.f32 %v1483_v59, %v2141_v18  ;;  %v1486_v47 = vperm.slane %v1469_v29, 1  ;;  %v2913_v29 = vld [vmem:[#allocation19_spill] sm:$0xff] }
 0x38d   : > { %1545 = vst [vmem:[%s2781_s24 + $0x10] sm:$0xff] %v1513_v9  ;;  %v1520_v34 = vmul.f32 %v1484_v54, %v2144_v19  ;;  %v1521_v61 = vmul.f32 %v1483_v59, %v2147_v24  ;;  %v1522_v63 = vmul.f32 %v1484_v54, %v2150_v25  ;;  %v1473_v2 = vrot.slane %v1472_v41, 5  ;;  %v2897_v25 = vld [vmem:[#allocation3_spill] sm:$0xff]  ;;  %v2912_v9 = vld [vmem:[#allocation18_spill] sm:$0xff] }
 0x38e   : > { %1546 = vst [vmem:[%s2781_s24 + $0x18] sm:$0xff] %v1514_v12  ;;  %v1487_v10 = vperm.slane %v1471_v11, 0  ;;  %v1523_v18 = vmul.f32 %v1485_v5, %v2233_v31  ;;  %v1488_v22 = vperm.slane %v1471_v11, 1  ;;  %v1524_v19 = vmul.f32 %v1486_v47, %v2236_v33 }
 0x38f   : > { %1547 = vst [vmem:[%s2781_s24 + $0x20] sm:$0xff] %v1515_v8  ;;  %vm1476_vm2 = vcmask 1046528   ;;  %v1525_v24 = vmul.f32 %v1485_v5, %v2217_v17  ;;  %v1526_v21 = vmul.f32 %v1486_v47, %v2897_v25  ;;  %v1475_v38 = vrot.slane %v1474_v45, 6 }
 0x390   : > { %1548 = vst [vmem:[%s2781_s24 + $0x28] sm:$0xff] %v1516_v6  ;;  %v1489_v31 = vperm.slane %v1473_v2, 0  ;;  %v1527_v44 = vmul.f32 %v1487_v10, %v2898_v57  ;;  %v1477_v40 = vsel %vm1476_vm2, %v1461_v13, %v1457_v48  ;;  %v1490_v33 = vperm.slane %v1473_v2, 1  ;;  %v2906_v48 = vld [vmem:[#allocation14_spill] sm:$0xff] }
 0x391   : > { %1549 = vst [vmem:[%s2781_s24 + $0x30] sm:$0xff] %v1517_v3  ;;  %v1528_v60 = vmul.f32 %v1488_v22, %v2899_v32  ;;  %v1529_v17 = vmul.f32 %v1487_v10, %v2900_v50  ;;  %v1530_v28 = vmul.f32 %v1488_v22, %v2901_v53  ;;  %v1478_v52 = vrot.slane %v1477_v40, 7 }
 0x392   : > { %1550 = vst [vmem:[%s2781_s24 + $0x38] sm:$0xff] %v1518_v37  ;;  %v1491_v23 = vperm.slane %v1475_v38, 0  ;;  %v1531_v42 = vmul.f32 %v1489_v31, %v2902_v1  ;;  %v1492_v4 = vperm.slane %v1475_v38, 1  ;;  %v1532_v27 = vmul.f32 %v1490_v33, %v2903_v15 }
 0x393   : > { %1551 = vst [vmem:[%s2781_s24 + $0x40] sm:$0xff] %v1519_v62  ;;  %v1533_v49 = vmul.f32 %v1489_v31, %v2904_v51  ;;  %v1534_v58 = vmul.f32 %v1490_v33, %v2905_v43  ;;  %v1493_v13 = vperm.slane %v1478_v52, 0  ;;  %v1494_v36 = vperm.slane %v1478_v52, 1 }
 0x394   : > { %1552 = vst [vmem:[%s2781_s24 + $0x48] sm:$0xff] %v1520_v34  ;;  %v1535_v26 = vmul.f32 %v1491_v23, %v2906_v48  ;;  %v1536_v16 = vmul.f32 %v1492_v4, %v2907_v56  ;;  %v1537_v46 = vmul.f32 %v1491_v23, %v2908_v14  ;;  %v1538_v0 = vmul.f32 %v1492_v4, %v2909_v30 }
 0x395   : > { %1553 = vst [vmem:[%s2781_s24 + $0x50] sm:$0xff] %v1521_v61  ;;  %v1539_v35 = vmul.f32 %v1493_v13, %v2910_v39  ;;  %v1540_v20 = vmul.f32 %v1494_v36, %v2911_v55  ;;  %v1541_v12 = vmul.f32 %v1493_v13, %v2912_v9  ;;  %v1542_v59 = vmul.f32 %v1494_v36, %v2913_v29 }
 0x396   : > { %1554 = vst [vmem:[%s2781_s24 + $0x58] sm:$0xff] %v1522_v63 }
 0x397   : > { %1555 = vst [vmem:[%s2781_s24 + $0x60] sm:$0xff] %v1523_v18 }
 0x398   : > { %1556 = vst [vmem:[%s2781_s24 + $0x68] sm:$0xff] %v1524_v19 }
 0x399   : > { %1557 = vst [vmem:[%s2781_s24 + $0x70] sm:$0xff] %v1525_v24 }
 0x39a   : > { %1558 = vst [vmem:[%s2781_s24 + $0x78] sm:$0xff] %v1526_v21 }
 0x39b   : > { %1559 = vst [vmem:[%s2781_s24 + $0x80] sm:$0xff] %v1527_v44 }
 0x39c   : > { %1560 = vst [vmem:[%s2781_s24 + $0x88] sm:$0xff] %v1528_v60 }
 0x39d   : > { %1561 = vst [vmem:[%s2781_s24 + $0x90] sm:$0xff] %v1529_v17 }
 0x39e   : > { %1562 = vst [vmem:[%s2781_s24 + $0x98] sm:$0xff] %v1530_v28 }
 0x39f   : > { %1563 = vst [vmem:[%s2781_s24 + $0xa0] sm:$0xff] %v1531_v42 }
 0x3a0   : > { %1564 = vst [vmem:[%s2781_s24 + $0xa8] sm:$0xff] %v1532_v27 }
 0x3a1   : > { %1565 = vst [vmem:[%s2781_s24 + $0xb0] sm:$0xff] %v1533_v49 }
 0x3a2   : > { %1566 = vst [vmem:[%s2781_s24 + $0xb8] sm:$0xff] %v1534_v58 }
 0x3a3   : > { %1567 = vst [vmem:[%s2781_s24 + $0xc0] sm:$0xff] %v1535_v26 }
 0x3a4   : > { %1568 = vst [vmem:[%s2781_s24 + $0xc8] sm:$0xff] %v1536_v16 }
 0x3a5   : > { %1569 = vst [vmem:[%s2781_s24 + $0xd0] sm:$0xff] %v1537_v46 }
 0x3a6   : > { %1570 = vst [vmem:[%s2781_s24 + $0xd8] sm:$0xff] %v1538_v0 }
 0x3a7   : > { %1571 = vst [vmem:[%s2781_s24 + $0xe0] sm:$0xff] %v1539_v35 }
 0x3a8   : > { %1572 = vst [vmem:[%s2781_s24 + $0xe8] sm:$0xff] %v1540_v20 }
 0x3a9   : > { %1573 = vst [vmem:[%s2781_s24 + $0xf0] sm:$0xff] %v1541_v12 }
 0x3aa   : > { %1574 = vst [vmem:[%s2781_s24 + $0xf8] sm:$0xff] %v1542_v59 }
 0x3ab PF: > { %s19_s29 = sadd.s32 1, %s1712_s29  }
 0x3ac   : > { %p16_p4 = scmp.ge.s32.totalorder %s19_s29, 4  }
 0x3ae   :  { %18 = sbr.rel (!%p16_p4) target bundleno = 2 (0x2), region = 82 }

</bundles_post_ra>
